<compile_context>
chip_gen: v6e
topology: v6e:2x2x1
jax: 0.10.0
libtpu: 0.0.40
codegen_flags: <defaults>
</compile_context>

<pallas_src>
import jax
import jax.numpy as jnp
from jax.experimental import pallas as pl
from jax.experimental.pallas import tpu as pltpu

# ---- configuration (small shapes implied by the module) ----------------------
BS = 2            # batch size
T_SEQ = 8         # sequence length (time-major, PyTorch LSTM default layout)
IN_DIM = 3        # input_dim (coordinates)
IN_PAD = 8        # padded contraction dim for the input-path dot
EMB = 64          # embedding_dim
HID = 32          # hidden_dim
NL = 2            # n_layers
G8 = 8 * HID      # 256 combined gate columns: [i1 f1 o1 | i0 f0 o0 | g1 | g0]


# ---- single fused kernel: embedding(pre-composed) + 2-layer masked LSTM ------
def _encoder_kernel(src_ref, len_ref, wadd_ref, badd_ref, wcomb_ref, out_ref):
    # src_ref  : ((T_SEQ+1)*BS, IN_PAD) flattened time-major input, zero-padded
    #            with one extra "step" so every staggered iteration is uniform
    # len_ref  : (BS, 1) int32          per-sequence valid length
    # wadd_ref : (IN_PAD, G8)           emb-composed layer-0 input weights,
    #                                   scattered into the combined layout
    # badd_ref : (1, G8)                b1 in layer-1 cols, composed b0 in layer-0 cols
    # wcomb_ref: (2*HID, G8)            staggered recurrent weight (see header)
    # out_ref  : (BS, 4*HID)            [h0 | h1 | c0 | c1] lane-dense store
    H = HID

    # Layer-0 input-path gate terms for ALL steps with ONE MXU dot (off the
    # serial chain); also deposits the constant b1 into the layer-1 columns.
    add = (jnp.dot(src_ref[...], wadd_ref[...],
                   preferred_element_type=jnp.float32)
           + badd_ref[...])                                       # ((T+1)*BS, G8)

    # Validity masks for all steps, hoisted out of the loop (one compare).
    seqlen = len_ref[...]                                          # (BS, 1) int32
    t_idx = jax.lax.broadcasted_iota(jnp.int32, (T_SEQ + 1, BS, H), 0)
    masks = seqlen[None, :, :] > t_idx                             # (T+1, BS, H) bool

    wcomb = wcomb_ref[...]                                         # (2H, G8)

    h0 = jnp.zeros((BS, H), jnp.float32)
    c0 = jnp.zeros((BS, H), jnp.float32)
    h1 = jnp.zeros((BS, H), jnp.float32)
    c1 = jnp.zeros((BS, H), jnp.float32)

    # --- prologue: layer-0 cell at t = 0 (recurrent term is zero: h0_init = 0)
    pre0 = add[0:BS, :]
    s0 = jax.nn.sigmoid(pre0[:, 3 * H:6 * H])                      # [i0 f0 o0]
    g0 = jnp.tanh(pre0[:, 7 * H:8 * H])
    i0g, f0g, o0g = s0[:, 0:H], s0[:, H:2 * H], s0[:, 2 * H:3 * H]
    c0n = f0g * c0 + i0g * g0
    h0n = o0g * jnp.tanh(c0n)
    h0 = jnp.where(masks[0], h0n, h0)
    c0 = jnp.where(masks[0], c0n, c0)
    h0n_cur = h0n                                                  # feeds layer-1 step 0

    # --- staggered main loop: iteration t handles layer-1 of step t and
    #     layer-0 of step t+1 with ONE MXU dot + fused wide activations.
    #     Fully unrolled (fixed trip count 8) for scheduler visibility.
    for t in range(T_SEQ):
        comb = jnp.dot(jnp.concatenate([h0n_cur, h1], axis=1), wcomb,
                       preferred_element_type=jnp.float32)         # (BS, G8)
        pre = comb + add[(t + 1) * BS:(t + 2) * BS, :]

        sig = jax.nn.sigmoid(pre[:, 0:6 * H])                      # [i1 f1 o1 i0 f0 o0]: 1 push
        tg = jnp.tanh(pre[:, 6 * H:8 * H])                         # [g1 g0]          : 1 push
        i1g, f1g, o1g = sig[:, 0:H], sig[:, H:2 * H], sig[:, 2 * H:3 * H]
        i0g, f0g, o0g = sig[:, 3 * H:4 * H], sig[:, 4 * H:5 * H], sig[:, 5 * H:6 * H]
        g1 = tg[:, 0:H]
        g0 = tg[:, H:2 * H]

        c1n = f1g * c1 + i1g * g1                                  # layer-1, step t
        c0n = f0g * c0 + i0g * g0                                  # layer-0, step t+1
        tcc = jnp.tanh(jnp.concatenate([c1n, c0n], axis=1))        # both cell tanh : 1 push
        h1n = o1g * tcc[:, 0:H]
        h0n_nxt = o0g * tcc[:, H:2 * H]

        # packed-sequence semantics: freeze states once t >= seq_len[b].
        # masks are monotone in t, so feeding the UNMASKED h0n into the
        # recurrence is safe (its effect is masked out downstream), and
        # masks[T_SEQ] is all-False so the extra layer-0 step is discarded.
        h1 = jnp.where(masks[t], h1n, h1)
        c1 = jnp.where(masks[t], c1n, c1)
        h0 = jnp.where(masks[t + 1], h0n_nxt, h0)
        c0 = jnp.where(masks[t + 1], c0n, c0)
        h0n_cur = h0n_nxt

    # single lane-dense (BS, 128) store; wrapper splits into (hidden, cell)
    out_ref[...] = jnp.concatenate([h0, h1, c0, c1], axis=1)


# ---- parameter init (deterministic, PyTorch-shaped) ---------------------------
def init_params(key):
    ks = jax.random.split(key, 3)

    def u(k, shape, fan_in):
        b = 1.0 / jnp.sqrt(jnp.float32(fan_in))
        return jax.random.uniform(k, shape, jnp.float32, -b, b)

    p = {}
    p['emb_w'] = u(ks[0], (EMB, IN_DIM), IN_DIM)     # coordinate2emb weight
    p['emb_b'] = u(ks[1], (EMB,), IN_DIM)            # coordinate2emb bias
    lstm = []
    kk = jax.random.split(ks[2], NL * 4)
    for l in range(NL):
        in_dim = EMB if l == 0 else HID
        lstm.append(dict(
            w_ih=u(kk[4 * l + 0], (4 * HID, in_dim), HID),
            w_hh=u(kk[4 * l + 1], (4 * HID, HID), HID),
            b_ih=u(kk[4 * l + 2], (4 * HID,), HID),
            b_hh=u(kk[4 * l + 3], (4 * HID,), HID)))
    p['lstm'] = lstm
    return p


# ---- one-time weight re-layout / pre-composition (hoisted out of forward) -----
def prepare_params(p):
    hp = jax.lax.Precision.HIGHEST
    l0, l1 = p['lstm']

    def split_gates(m):
        # last axis is 4H in PyTorch gate order [i, f, g, o]
        return jnp.split(m, 4, axis=-1)

    # Layer-0 input path with coordinate2emb pre-composed (eval-mode: no
    # dropout between the Linear and the LSTM).
    w0in = jnp.dot(p['emb_w'].T, l0['w_ih'].T, precision=hp)             # (IN, 4H)
    b0 = (jnp.dot(p['emb_b'], l0['w_ih'].T, precision=hp)
          + l0['b_ih'] + l0['b_hh'])                                     # (4H,)
    b1 = l1['b_ih'] + l1['b_hh']                                         # (4H,)

    i0a, f0a, g0a, o0a = split_gates(w0in)
    bi0, bf0, bg0, bo0 = split_gates(b0)
    bi1, bf1, bg1, bo1 = split_gates(b1)

    # Staggered combined recurrent weight; LHS of the per-step dot is
    # [h0n(t), h1(t-1)] of width 2H.
    w1 = jnp.concatenate([l1['w_ih'].T, l1['w_hh'].T], axis=0)           # (2H, 4H)
    w0r = jnp.concatenate([l0['w_hh'].T,
                           jnp.zeros((HID, 4 * HID), jnp.float32)], axis=0)  # (2H, 4H)
    i1w, f1w, g1w, o1w = split_gates(w1)
    i0w, f0w, g0w, o0w = split_gates(w0r)

    # Global 256-column layout: [i1 f1 o1 | i0 f0 o0 | g1 | g0]
    w_comb = jnp.concatenate([i1w, f1w, o1w, i0w, f0w, o0w, g1w, g0w], axis=1)  # (2H, G8)

    zi = jnp.zeros((IN_DIM, HID), jnp.float32)
    w_add = jnp.concatenate([zi, zi, zi, i0a, f0a, o0a, zi, g0a], axis=1)       # (IN, G8)
    w_add = jnp.concatenate(
        [w_add, jnp.zeros((IN_PAD - IN_DIM, G8), jnp.float32)], axis=0)         # (IN_PAD, G8)
    b_add = jnp.concatenate([bi1, bf1, bo1, bi0, bf0, bo0, bg1, bg0]).reshape(1, G8)

    return dict(w_comb=w_comb, w_add=w_add, b_add=b_add)


# ---- forward wrapper -----------------------------------------------------------
@jax.jit
def encoder_forward(prep, src, seq_len):
    """src: (T_SEQ, BS, IN_DIM); seq_len: (BS,) -> (hidden, cell) each (NL, BS, HID)."""
    src = src.astype(jnp.float32)
    # flatten time-major input, pad one extra zero "step" and pad the
    # contraction dim 3 -> 8 (makes every staggered iteration uniform and the
    # input-path dot tile-friendly).
    src_flat = src.reshape(T_SEQ * BS, IN_DIM)
    src2d = jnp.zeros(((T_SEQ + 1) * BS, IN_PAD), jnp.float32)
    src2d = src2d.at[:T_SEQ * BS, :IN_DIM].set(src_flat)
    len_i = seq_len.astype(jnp.int32).reshape(BS, 1)

    out = pl.pallas_call(
        _encoder_kernel,
        out_shape=jax.ShapeDtypeStruct((BS, 4 * HID), jnp.float32),
        in_specs=[pl.BlockSpec(memory_space=pltpu.MemorySpace.VMEM)] * 5,
        out_specs=pl.BlockSpec(memory_space=pltpu.MemorySpace.VMEM),
    )(src2d, len_i, prep['w_add'], prep['b_add'], prep['w_comb'])

    hidden = jnp.stack([out[:, 0:HID], out[:, HID:2 * HID]], axis=0)     # (NL, BS, HID)
    cell = jnp.stack([out[:, 2 * HID:3 * HID], out[:, 3 * HID:4 * HID]], axis=0)
    return hidden, cell


# ---- pure-JAX reference (PyTorch gate order, packed-seq masking) ---------------
def reference_forward(params, src, seq_len):
    hp = jax.lax.Precision.HIGHEST
    emb = jnp.einsum('tbi,ei->tbe', src, params['emb_w'], precision=hp) + params['emb_b']
    h = [jnp.zeros((BS, HID), jnp.float32) for _ in range(NL)]
    c = [jnp.zeros((BS, HID), jnp.float32) for _ in range(NL)]
    for t in range(T_SEQ):
        x = emb[t]
        m = (seq_len > t).reshape(BS, 1)
        for l in range(NL):
            lw = params['lstm'][l]
            gates = (jnp.dot(x, lw['w_ih'].T, precision=hp) + lw['b_ih']
                     + jnp.dot(h[l], lw['w_hh'].T, precision=hp) + lw['b_hh'])
            i_g = jax.nn.sigmoid(gates[:, :HID])
            f_g = jax.nn.sigmoid(gates[:, HID:2 * HID])
            g_g = jnp.tanh(gates[:, 2 * HID:3 * HID])
            o_g = jax.nn.sigmoid(gates[:, 3 * HID:])
            cn = f_g * c[l] + i_g * g_g
            hn = o_g * jnp.tanh(cn)
            h[l] = jnp.where(m, hn, h[l])
            c[l] = jnp.where(m, cn, c[l])
            x = hn
    return jnp.stack(h, 0), jnp.stack(c, 0)


if __name__ == "__main__":
    key = jax.random.PRNGKey(0)
    pk, xk = jax.random.split(key, 2)
    params = init_params(pk)
    prep = prepare_params(params)

    src = jax.random.normal(xk, (T_SEQ, BS, IN_DIM), jnp.float32)
    seq_len = jnp.array([T_SEQ, 5], jnp.int32)          # variable lengths (packed-seq)

    hidden, cell = encoder_forward(prep, src, seq_len)
    hidden, cell = jax.block_until_ready((hidden, cell))

    assert hidden.shape == (NL, BS, HID) and cell.shape == (NL, BS, HID)
    assert bool(jnp.all(jnp.isfinite(hidden))) and bool(jnp.all(jnp.isfinite(cell)))

    h_ref, c_ref = reference_forward(params, src, seq_len)
    # In-kernel dots use MXU default precision with f32 accumulation; the
    # tolerance covers the (small) bf16-pass drift vs the f32 reference.
    assert bool(jnp.allclose(hidden, h_ref, atol=2e-2, rtol=2e-2))
    assert bool(jnp.allclose(cell, c_ref, atol=2e-2, rtol=2e-2))

    print("KERNEL_OK")
</pallas_src>

<mosaic_0001>
module attributes {stable_mosaic.version = 11 : i64} {
  func.func @_encoder_kernel(%arg0: memref<18x8xf32, #tpu.memory_space<vmem>>, %arg1: memref<2x1xi32, #tpu.memory_space<vmem>>, %arg2: memref<8x256xf32, #tpu.memory_space<vmem>>, %arg3: memref<1x256xf32, #tpu.memory_space<vmem>>, %arg4: memref<64x256xf32, #tpu.memory_space<vmem>>, %arg5: memref<2x128xf32, #tpu.memory_space<vmem>>) attributes {dimension_semantics = [], scalar_prefetch = 0 : i64, scratch_operands = 0 : i64, tpu.core_type = #tpu.core_type<tc>} {
    %c0 = arith.constant 0 : index
    %c0_0 = arith.constant 0 : index
    %0 = vector.load %arg0[%c0, %c0_0] : memref<18x8xf32, #tpu.memory_space<vmem>>, vector<18x8xf32>
    %c0_1 = arith.constant 0 : index
    %c0_2 = arith.constant 0 : index
    %1 = vector.load %arg2[%c0_1, %c0_2] : memref<8x256xf32, #tpu.memory_space<vmem>>, vector<8x256xf32>
    %cst = arith.constant dense<0.000000e+00> : vector<18x256xf32>
    %2 = tpu.matmul %0, %1, %cst {dimension_numbers = #tpu.dot_dimension_numbers<[1], [0], [0], [1], [0, 0, 1, 1], [], []>} : vector<18x8xf32>, vector<8x256xf32>, vector<18x256xf32> -> vector<18x256xf32>
    %c0_3 = arith.constant 0 : index
    %c0_4 = arith.constant 0 : index
    %3 = vector.load %arg3[%c0_3, %c0_4] : memref<1x256xf32, #tpu.memory_space<vmem>>, vector<1x256xf32>
    %4 = vector.broadcast %3 : vector<1x256xf32> to vector<18x256xf32>
    %5 = arith.addf %2, %4 : vector<18x256xf32>
    %c0_5 = arith.constant 0 : index
    %c0_6 = arith.constant 0 : index
    %6 = vector.load %arg1[%c0_5, %c0_6] : memref<2x1xi32, #tpu.memory_space<vmem>>, vector<2x1xi32>
    %7 = tpu.iota {dimensions = array<i32: 0>} : vector<9x2x32xi32>
    %8 = vector.shape_cast %6 : vector<2x1xi32> to vector<1x2x1xi32>
    %9 = vector.broadcast %8 : vector<1x2x1xi32> to vector<9x2x32xi32>
    %10 = arith.cmpi sgt, %9, %7 : vector<9x2x32xi32>
    %c0_7 = arith.constant 0 : index
    %c0_8 = arith.constant 0 : index
    %11 = vector.load %arg4[%c0_7, %c0_8] : memref<64x256xf32, #tpu.memory_space<vmem>>, vector<64x256xf32>
    %cst_9 = arith.constant 0.000000e+00 : f32
    %12 = vector.broadcast %cst_9 : f32 to vector<2x32xf32>
    %cst_10 = arith.constant 0.000000e+00 : f32
    %13 = vector.broadcast %cst_10 : f32 to vector<2x32xf32>
    %cst_11 = arith.constant 0.000000e+00 : f32
    %14 = vector.broadcast %cst_11 : f32 to vector<2x32xf32>
    %cst_12 = arith.constant 0.000000e+00 : f32
    %15 = vector.broadcast %cst_12 : f32 to vector<2x32xf32>
    %16 = vector.extract_strided_slice %5 {offsets = [0, 0], sizes = [2, 256], strides = [1, 1]} : vector<18x256xf32> to vector<2x256xf32>
    %17 = vector.extract_strided_slice %16 {offsets = [0, 96], sizes = [2, 96], strides = [1, 1]} : vector<2x256xf32> to vector<2x96xf32>
    %18 = arith.negf %17 : vector<2x96xf32>
    %19 = math.exp %18 : vector<2x96xf32>
    %cst_13 = arith.constant 1.000000e+00 : f32
    %20 = vector.broadcast %cst_13 : f32 to vector<2x96xf32>
    %21 = arith.addf %20, %19 : vector<2x96xf32>
    %22 = arith.divf %20, %21 : vector<2x96xf32>
    %23 = vector.extract_strided_slice %16 {offsets = [0, 224], sizes = [2, 32], strides = [1, 1]} : vector<2x256xf32> to vector<2x32xf32>
    %24 = math.tanh %23 : vector<2x32xf32>
    %25 = vector.extract_strided_slice %22 {offsets = [0, 0], sizes = [2, 32], strides = [1, 1]} : vector<2x96xf32> to vector<2x32xf32>
    %26 = vector.extract_strided_slice %22 {offsets = [0, 32], sizes = [2, 32], strides = [1, 1]} : vector<2x96xf32> to vector<2x32xf32>
    %27 = vector.extract_strided_slice %22 {offsets = [0, 64], sizes = [2, 32], strides = [1, 1]} : vector<2x96xf32> to vector<2x32xf32>
    %28 = arith.mulf %26, %13 : vector<2x32xf32>
    %29 = arith.mulf %25, %24 : vector<2x32xf32>
    %30 = arith.addf %28, %29 : vector<2x32xf32>
    %31 = math.tanh %30 : vector<2x32xf32>
    %32 = arith.mulf %27, %31 : vector<2x32xf32>
    %33 = vector.extract_strided_slice %10 {offsets = [0, 0, 0], sizes = [1, 2, 32], strides = [1, 1, 1]} : vector<9x2x32xi1> to vector<1x2x32xi1>
    %34 = vector.shape_cast %33 : vector<1x2x32xi1> to vector<2x32xi1>
    %35 = arith.select %34, %32, %12 : vector<2x32xi1>, vector<2x32xf32>
    %36 = vector.extract_strided_slice %10 {offsets = [0, 0, 0], sizes = [1, 2, 32], strides = [1, 1, 1]} : vector<9x2x32xi1> to vector<1x2x32xi1>
    %37 = vector.shape_cast %36 : vector<1x2x32xi1> to vector<2x32xi1>
    %38 = arith.select %37, %30, %13 : vector<2x32xi1>, vector<2x32xf32>
    %39 = tpu.concatenate %32, %14 in 1 : vector<2x32xf32>, vector<2x32xf32> -> vector<2x64xf32>
    %cst_14 = arith.constant dense<0.000000e+00> : vector<2x256xf32>
    %40 = tpu.matmul %39, %11, %cst_14 {dimension_numbers = #tpu.dot_dimension_numbers<[1], [0], [0], [1], [0, 0, 1, 1], [], []>} : vector<2x64xf32>, vector<64x256xf32>, vector<2x256xf32> -> vector<2x256xf32>
    %41 = vector.extract_strided_slice %5 {offsets = [2, 0], sizes = [2, 256], strides = [1, 1]} : vector<18x256xf32> to vector<2x256xf32>
    %42 = arith.addf %40, %41 : vector<2x256xf32>
    %43 = vector.extract_strided_slice %42 {offsets = [0, 0], sizes = [2, 192], strides = [1, 1]} : vector<2x256xf32> to vector<2x192xf32>
    %44 = arith.negf %43 : vector<2x192xf32>
    %45 = math.exp %44 : vector<2x192xf32>
    %cst_15 = arith.constant 1.000000e+00 : f32
    %46 = vector.broadcast %cst_15 : f32 to vector<2x192xf32>
    %47 = arith.addf %46, %45 : vector<2x192xf32>
    %48 = arith.divf %46, %47 : vector<2x192xf32>
    %49 = vector.extract_strided_slice %42 {offsets = [0, 192], sizes = [2, 64], strides = [1, 1]} : vector<2x256xf32> to vector<2x64xf32>
    %50 = math.tanh %49 : vector<2x64xf32>
    %51 = vector.extract_strided_slice %48 {offsets = [0, 0], sizes = [2, 32], strides = [1, 1]} : vector<2x192xf32> to vector<2x32xf32>
    %52 = vector.extract_strided_slice %48 {offsets = [0, 32], sizes = [2, 32], strides = [1, 1]} : vector<2x192xf32> to vector<2x32xf32>
    %53 = vector.extract_strided_slice %48 {offsets = [0, 64], sizes = [2, 32], strides = [1, 1]} : vector<2x192xf32> to vector<2x32xf32>
    %54 = vector.extract_strided_slice %48 {offsets = [0, 96], sizes = [2, 32], strides = [1, 1]} : vector<2x192xf32> to vector<2x32xf32>
    %55 = vector.extract_strided_slice %48 {offsets = [0, 128], sizes = [2, 32], strides = [1, 1]} : vector<2x192xf32> to vector<2x32xf32>
    %56 = vector.extract_strided_slice %48 {offsets = [0, 160], sizes = [2, 32], strides = [1, 1]} : vector<2x192xf32> to vector<2x32xf32>
    %57 = vector.extract_strided_slice %50 {offsets = [0, 0], sizes = [2, 32], strides = [1, 1]} : vector<2x64xf32> to vector<2x32xf32>
    %58 = vector.extract_strided_slice %50 {offsets = [0, 32], sizes = [2, 32], strides = [1, 1]} : vector<2x64xf32> to vector<2x32xf32>
    %59 = arith.mulf %52, %15 : vector<2x32xf32>
    %60 = arith.mulf %51, %57 : vector<2x32xf32>
    %61 = arith.addf %59, %60 : vector<2x32xf32>
    %62 = arith.mulf %55, %38 : vector<2x32xf32>
    %63 = arith.mulf %54, %58 : vector<2x32xf32>
    %64 = arith.addf %62, %63 : vector<2x32xf32>
    %65 = tpu.concatenate %61, %64 in 1 : vector<2x32xf32>, vector<2x32xf32> -> vector<2x64xf32>
    %66 = math.tanh %65 : vector<2x64xf32>
    %67 = vector.extract_strided_slice %66 {offsets = [0, 0], sizes = [2, 32], strides = [1, 1]} : vector<2x64xf32> to vector<2x32xf32>
    %68 = arith.mulf %53, %67 : vector<2x32xf32>
    %69 = vector.extract_strided_slice %66 {offsets = [0, 32], sizes = [2, 32], strides = [1, 1]} : vector<2x64xf32> to vector<2x32xf32>
    %70 = arith.mulf %56, %69 : vector<2x32xf32>
    %71 = vector.extract_strided_slice %10 {offsets = [0, 0, 0], sizes = [1, 2, 32], strides = [1, 1, 1]} : vector<9x2x32xi1> to vector<1x2x32xi1>
    %72 = vector.shape_cast %71 : vector<1x2x32xi1> to vector<2x32xi1>
    %73 = arith.select %72, %68, %14 : vector<2x32xi1>, vector<2x32xf32>
    %74 = vector.extract_strided_slice %10 {offsets = [0, 0, 0], sizes = [1, 2, 32], strides = [1, 1, 1]} : vector<9x2x32xi1> to vector<1x2x32xi1>
    %75 = vector.shape_cast %74 : vector<1x2x32xi1> to vector<2x32xi1>
    %76 = arith.select %75, %61, %15 : vector<2x32xi1>, vector<2x32xf32>
    %77 = vector.extract_strided_slice %10 {offsets = [1, 0, 0], sizes = [1, 2, 32], strides = [1, 1, 1]} : vector<9x2x32xi1> to vector<1x2x32xi1>
    %78 = vector.shape_cast %77 : vector<1x2x32xi1> to vector<2x32xi1>
    %79 = arith.select %78, %70, %35 : vector<2x32xi1>, vector<2x32xf32>
    %80 = vector.extract_strided_slice %10 {offsets = [1, 0, 0], sizes = [1, 2, 32], strides = [1, 1, 1]} : vector<9x2x32xi1> to vector<1x2x32xi1>
    %81 = vector.shape_cast %80 : vector<1x2x32xi1> to vector<2x32xi1>
    %82 = arith.select %81, %64, %38 : vector<2x32xi1>, vector<2x32xf32>
    %83 = tpu.concatenate %70, %73 in 1 : vector<2x32xf32>, vector<2x32xf32> -> vector<2x64xf32>
    %cst_16 = arith.constant dense<0.000000e+00> : vector<2x256xf32>
    %84 = tpu.matmul %83, %11, %cst_16 {dimension_numbers = #tpu.dot_dimension_numbers<[1], [0], [0], [1], [0, 0, 1, 1], [], []>} : vector<2x64xf32>, vector<64x256xf32>, vector<2x256xf32> -> vector<2x256xf32>
    %85 = vector.extract_strided_slice %5 {offsets = [4, 0], sizes = [2, 256], strides = [1, 1]} : vector<18x256xf32> to vector<2x256xf32>
    %86 = arith.addf %84, %85 : vector<2x256xf32>
    %87 = vector.extract_strided_slice %86 {offsets = [0, 0], sizes = [2, 192], strides = [1, 1]} : vector<2x256xf32> to vector<2x192xf32>
    %88 = arith.negf %87 : vector<2x192xf32>
    %89 = math.exp %88 : vector<2x192xf32>
    %cst_17 = arith.constant 1.000000e+00 : f32
    %90 = vector.broadcast %cst_17 : f32 to vector<2x192xf32>
    %91 = arith.addf %90, %89 : vector<2x192xf32>
    %92 = arith.divf %90, %91 : vector<2x192xf32>
    %93 = vector.extract_strided_slice %86 {offsets = [0, 192], sizes = [2, 64], strides = [1, 1]} : vector<2x256xf32> to vector<2x64xf32>
    %94 = math.tanh %93 : vector<2x64xf32>
    %95 = vector.extract_strided_slice %92 {offsets = [0, 0], sizes = [2, 32], strides = [1, 1]} : vector<2x192xf32> to vector<2x32xf32>
    %96 = vector.extract_strided_slice %92 {offsets = [0, 32], sizes = [2, 32], strides = [1, 1]} : vector<2x192xf32> to vector<2x32xf32>
    %97 = vector.extract_strided_slice %92 {offsets = [0, 64], sizes = [2, 32], strides = [1, 1]} : vector<2x192xf32> to vector<2x32xf32>
    %98 = vector.extract_strided_slice %92 {offsets = [0, 96], sizes = [2, 32], strides = [1, 1]} : vector<2x192xf32> to vector<2x32xf32>
    %99 = vector.extract_strided_slice %92 {offsets = [0, 128], sizes = [2, 32], strides = [1, 1]} : vector<2x192xf32> to vector<2x32xf32>
    %100 = vector.extract_strided_slice %92 {offsets = [0, 160], sizes = [2, 32], strides = [1, 1]} : vector<2x192xf32> to vector<2x32xf32>
    %101 = vector.extract_strided_slice %94 {offsets = [0, 0], sizes = [2, 32], strides = [1, 1]} : vector<2x64xf32> to vector<2x32xf32>
    %102 = vector.extract_strided_slice %94 {offsets = [0, 32], sizes = [2, 32], strides = [1, 1]} : vector<2x64xf32> to vector<2x32xf32>
    %103 = arith.mulf %96, %76 : vector<2x32xf32>
    %104 = arith.mulf %95, %101 : vector<2x32xf32>
    %105 = arith.addf %103, %104 : vector<2x32xf32>
    %106 = arith.mulf %99, %82 : vector<2x32xf32>
    %107 = arith.mulf %98, %102 : vector<2x32xf32>
    %108 = arith.addf %106, %107 : vector<2x32xf32>
    %109 = tpu.concatenate %105, %108 in 1 : vector<2x32xf32>, vector<2x32xf32> -> vector<2x64xf32>
    %110 = math.tanh %109 : vector<2x64xf32>
    %111 = vector.extract_strided_slice %110 {offsets = [0, 0], sizes = [2, 32], strides = [1, 1]} : vector<2x64xf32> to vector<2x32xf32>
    %112 = arith.mulf %97, %111 : vector<2x32xf32>
    %113 = vector.extract_strided_slice %110 {offsets = [0, 32], sizes = [2, 32], strides = [1, 1]} : vector<2x64xf32> to vector<2x32xf32>
    %114 = arith.mulf %100, %113 : vector<2x32xf32>
    %115 = vector.extract_strided_slice %10 {offsets = [1, 0, 0], sizes = [1, 2, 32], strides = [1, 1, 1]} : vector<9x2x32xi1> to vector<1x2x32xi1>
    %116 = vector.shape_cast %115 : vector<1x2x32xi1> to vector<2x32xi1>
    %117 = arith.select %116, %112, %73 : vector<2x32xi1>, vector<2x32xf32>
    %118 = vector.extract_strided_slice %10 {offsets = [1, 0, 0], sizes = [1, 2, 32], strides = [1, 1, 1]} : vector<9x2x32xi1> to vector<1x2x32xi1>
    %119 = vector.shape_cast %118 : vector<1x2x32xi1> to vector<2x32xi1>
    %120 = arith.select %119, %105, %76 : vector<2x32xi1>, vector<2x32xf32>
    %121 = vector.extract_strided_slice %10 {offsets = [2, 0, 0], sizes = [1, 2, 32], strides = [1, 1, 1]} : vector<9x2x32xi1> to vector<1x2x32xi1>
    %122 = vector.shape_cast %121 : vector<1x2x32xi1> to vector<2x32xi1>
    %123 = arith.select %122, %114, %79 : vector<2x32xi1>, vector<2x32xf32>
    %124 = vector.extract_strided_slice %10 {offsets = [2, 0, 0], sizes = [1, 2, 32], strides = [1, 1, 1]} : vector<9x2x32xi1> to vector<1x2x32xi1>
    %125 = vector.shape_cast %124 : vector<1x2x32xi1> to vector<2x32xi1>
    %126 = arith.select %125, %108, %82 : vector<2x32xi1>, vector<2x32xf32>
    %127 = tpu.concatenate %114, %117 in 1 : vector<2x32xf32>, vector<2x32xf32> -> vector<2x64xf32>
    %cst_18 = arith.constant dense<0.000000e+00> : vector<2x256xf32>
    %128 = tpu.matmul %127, %11, %cst_18 {dimension_numbers = #tpu.dot_dimension_numbers<[1], [0], [0], [1], [0, 0, 1, 1], [], []>} : vector<2x64xf32>, vector<64x256xf32>, vector<2x256xf32> -> vector<2x256xf32>
    %129 = vector.extract_strided_slice %5 {offsets = [6, 0], sizes = [2, 256], strides = [1, 1]} : vector<18x256xf32> to vector<2x256xf32>
    %130 = arith.addf %128, %129 : vector<2x256xf32>
    %131 = vector.extract_strided_slice %130 {offsets = [0, 0], sizes = [2, 192], strides = [1, 1]} : vector<2x256xf32> to vector<2x192xf32>
    %132 = arith.negf %131 : vector<2x192xf32>
    %133 = math.exp %132 : vector<2x192xf32>
    %cst_19 = arith.constant 1.000000e+00 : f32
    %134 = vector.broadcast %cst_19 : f32 to vector<2x192xf32>
    %135 = arith.addf %134, %133 : vector<2x192xf32>
    %136 = arith.divf %134, %135 : vector<2x192xf32>
    %137 = vector.extract_strided_slice %130 {offsets = [0, 192], sizes = [2, 64], strides = [1, 1]} : vector<2x256xf32> to vector<2x64xf32>
    %138 = math.tanh %137 : vector<2x64xf32>
    %139 = vector.extract_strided_slice %136 {offsets = [0, 0], sizes = [2, 32], strides = [1, 1]} : vector<2x192xf32> to vector<2x32xf32>
    %140 = vector.extract_strided_slice %136 {offsets = [0, 32], sizes = [2, 32], strides = [1, 1]} : vector<2x192xf32> to vector<2x32xf32>
    %141 = vector.extract_strided_slice %136 {offsets = [0, 64], sizes = [2, 32], strides = [1, 1]} : vector<2x192xf32> to vector<2x32xf32>
    %142 = vector.extract_strided_slice %136 {offsets = [0, 96], sizes = [2, 32], strides = [1, 1]} : vector<2x192xf32> to vector<2x32xf32>
    %143 = vector.extract_strided_slice %136 {offsets = [0, 128], sizes = [2, 32], strides = [1, 1]} : vector<2x192xf32> to vector<2x32xf32>
    %144 = vector.extract_strided_slice %136 {offsets = [0, 160], sizes = [2, 32], strides = [1, 1]} : vector<2x192xf32> to vector<2x32xf32>
    %145 = vector.extract_strided_slice %138 {offsets = [0, 0], sizes = [2, 32], strides = [1, 1]} : vector<2x64xf32> to vector<2x32xf32>
    %146 = vector.extract_strided_slice %138 {offsets = [0, 32], sizes = [2, 32], strides = [1, 1]} : vector<2x64xf32> to vector<2x32xf32>
    %147 = arith.mulf %140, %120 : vector<2x32xf32>
    %148 = arith.mulf %139, %145 : vector<2x32xf32>
    %149 = arith.addf %147, %148 : vector<2x32xf32>
    %150 = arith.mulf %143, %126 : vector<2x32xf32>
    %151 = arith.mulf %142, %146 : vector<2x32xf32>
    %152 = arith.addf %150, %151 : vector<2x32xf32>
    %153 = tpu.concatenate %149, %152 in 1 : vector<2x32xf32>, vector<2x32xf32> -> vector<2x64xf32>
    %154 = math.tanh %153 : vector<2x64xf32>
    %155 = vector.extract_strided_slice %154 {offsets = [0, 0], sizes = [2, 32], strides = [1, 1]} : vector<2x64xf32> to vector<2x32xf32>
    %156 = arith.mulf %141, %155 : vector<2x32xf32>
    %157 = vector.extract_strided_slice %154 {offsets = [0, 32], sizes = [2, 32], strides = [1, 1]} : vector<2x64xf32> to vector<2x32xf32>
    %158 = arith.mulf %144, %157 : vector<2x32xf32>
    %159 = vector.extract_strided_slice %10 {offsets = [2, 0, 0], sizes = [1, 2, 32], strides = [1, 1, 1]} : vector<9x2x32xi1> to vector<1x2x32xi1>
    %160 = vector.shape_cast %159 : vector<1x2x32xi1> to vector<2x32xi1>
    %161 = arith.select %160, %156, %117 : vector<2x32xi1>, vector<2x32xf32>
    %162 = vector.extract_strided_slice %10 {offsets = [2, 0, 0], sizes = [1, 2, 32], strides = [1, 1, 1]} : vector<9x2x32xi1> to vector<1x2x32xi1>
    %163 = vector.shape_cast %162 : vector<1x2x32xi1> to vector<2x32xi1>
    %164 = arith.select %163, %149, %120 : vector<2x32xi1>, vector<2x32xf32>
    %165 = vector.extract_strided_slice %10 {offsets = [3, 0, 0], sizes = [1, 2, 32], strides = [1, 1, 1]} : vector<9x2x32xi1> to vector<1x2x32xi1>
    %166 = vector.shape_cast %165 : vector<1x2x32xi1> to vector<2x32xi1>
    %167 = arith.select %166, %158, %123 : vector<2x32xi1>, vector<2x32xf32>
    %168 = vector.extract_strided_slice %10 {offsets = [3, 0, 0], sizes = [1, 2, 32], strides = [1, 1, 1]} : vector<9x2x32xi1> to vector<1x2x32xi1>
    %169 = vector.shape_cast %168 : vector<1x2x32xi1> to vector<2x32xi1>
    %170 = arith.select %169, %152, %126 : vector<2x32xi1>, vector<2x32xf32>
    %171 = tpu.concatenate %158, %161 in 1 : vector<2x32xf32>, vector<2x32xf32> -> vector<2x64xf32>
    %cst_20 = arith.constant dense<0.000000e+00> : vector<2x256xf32>
    %172 = tpu.matmul %171, %11, %cst_20 {dimension_numbers = #tpu.dot_dimension_numbers<[1], [0], [0], [1], [0, 0, 1, 1], [], []>} : vector<2x64xf32>, vector<64x256xf32>, vector<2x256xf32> -> vector<2x256xf32>
    %173 = vector.extract_strided_slice %5 {offsets = [8, 0], sizes = [2, 256], strides = [1, 1]} : vector<18x256xf32> to vector<2x256xf32>
    %174 = arith.addf %172, %173 : vector<2x256xf32>
    %175 = vector.extract_strided_slice %174 {offsets = [0, 0], sizes = [2, 192], strides = [1, 1]} : vector<2x256xf32> to vector<2x192xf32>
    %176 = arith.negf %175 : vector<2x192xf32>
    %177 = math.exp %176 : vector<2x192xf32>
    %cst_21 = arith.constant 1.000000e+00 : f32
    %178 = vector.broadcast %cst_21 : f32 to vector<2x192xf32>
    %179 = arith.addf %178, %177 : vector<2x192xf32>
    %180 = arith.divf %178, %179 : vector<2x192xf32>
    %181 = vector.extract_strided_slice %174 {offsets = [0, 192], sizes = [2, 64], strides = [1, 1]} : vector<2x256xf32> to vector<2x64xf32>
    %182 = math.tanh %181 : vector<2x64xf32>
    %183 = vector.extract_strided_slice %180 {offsets = [0, 0], sizes = [2, 32], strides = [1, 1]} : vector<2x192xf32> to vector<2x32xf32>
    %184 = vector.extract_strided_slice %180 {offsets = [0, 32], sizes = [2, 32], strides = [1, 1]} : vector<2x192xf32> to vector<2x32xf32>
    %185 = vector.extract_strided_slice %180 {offsets = [0, 64], sizes = [2, 32], strides = [1, 1]} : vector<2x192xf32> to vector<2x32xf32>
    %186 = vector.extract_strided_slice %180 {offsets = [0, 96], sizes = [2, 32], strides = [1, 1]} : vector<2x192xf32> to vector<2x32xf32>
    %187 = vector.extract_strided_slice %180 {offsets = [0, 128], sizes = [2, 32], strides = [1, 1]} : vector<2x192xf32> to vector<2x32xf32>
    %188 = vector.extract_strided_slice %180 {offsets = [0, 160], sizes = [2, 32], strides = [1, 1]} : vector<2x192xf32> to vector<2x32xf32>
    %189 = vector.extract_strided_slice %182 {offsets = [0, 0], sizes = [2, 32], strides = [1, 1]} : vector<2x64xf32> to vector<2x32xf32>
    %190 = vector.extract_strided_slice %182 {offsets = [0, 32], sizes = [2, 32], strides = [1, 1]} : vector<2x64xf32> to vector<2x32xf32>
    %191 = arith.mulf %184, %164 : vector<2x32xf32>
    %192 = arith.mulf %183, %189 : vector<2x32xf32>
    %193 = arith.addf %191, %192 : vector<2x32xf32>
    %194 = arith.mulf %187, %170 : vector<2x32xf32>
    %195 = arith.mulf %186, %190 : vector<2x32xf32>
    %196 = arith.addf %194, %195 : vector<2x32xf32>
    %197 = tpu.concatenate %193, %196 in 1 : vector<2x32xf32>, vector<2x32xf32> -> vector<2x64xf32>
    %198 = math.tanh %197 : vector<2x64xf32>
    %199 = vector.extract_strided_slice %198 {offsets = [0, 0], sizes = [2, 32], strides = [1, 1]} : vector<2x64xf32> to vector<2x32xf32>
    %200 = arith.mulf %185, %199 : vector<2x32xf32>
    %201 = vector.extract_strided_slice %198 {offsets = [0, 32], sizes = [2, 32], strides = [1, 1]} : vector<2x64xf32> to vector<2x32xf32>
    %202 = arith.mulf %188, %201 : vector<2x32xf32>
    %203 = vector.extract_strided_slice %10 {offsets = [3, 0, 0], sizes = [1, 2, 32], strides = [1, 1, 1]} : vector<9x2x32xi1> to vector<1x2x32xi1>
    %204 = vector.shape_cast %203 : vector<1x2x32xi1> to vector<2x32xi1>
    %205 = arith.select %204, %200, %161 : vector<2x32xi1>, vector<2x32xf32>
    %206 = vector.extract_strided_slice %10 {offsets = [3, 0, 0], sizes = [1, 2, 32], strides = [1, 1, 1]} : vector<9x2x32xi1> to vector<1x2x32xi1>
    %207 = vector.shape_cast %206 : vector<1x2x32xi1> to vector<2x32xi1>
    %208 = arith.select %207, %193, %164 : vector<2x32xi1>, vector<2x32xf32>
    %209 = vector.extract_strided_slice %10 {offsets = [4, 0, 0], sizes = [1, 2, 32], strides = [1, 1, 1]} : vector<9x2x32xi1> to vector<1x2x32xi1>
    %210 = vector.shape_cast %209 : vector<1x2x32xi1> to vector<2x32xi1>
    %211 = arith.select %210, %202, %167 : vector<2x32xi1>, vector<2x32xf32>
    %212 = vector.extract_strided_slice %10 {offsets = [4, 0, 0], sizes = [1, 2, 32], strides = [1, 1, 1]} : vector<9x2x32xi1> to vector<1x2x32xi1>
    %213 = vector.shape_cast %212 : vector<1x2x32xi1> to vector<2x32xi1>
    %214 = arith.select %213, %196, %170 : vector<2x32xi1>, vector<2x32xf32>
    %215 = tpu.concatenate %202, %205 in 1 : vector<2x32xf32>, vector<2x32xf32> -> vector<2x64xf32>
    %cst_22 = arith.constant dense<0.000000e+00> : vector<2x256xf32>
    %216 = tpu.matmul %215, %11, %cst_22 {dimension_numbers = #tpu.dot_dimension_numbers<[1], [0], [0], [1], [0, 0, 1, 1], [], []>} : vector<2x64xf32>, vector<64x256xf32>, vector<2x256xf32> -> vector<2x256xf32>
    %217 = vector.extract_strided_slice %5 {offsets = [10, 0], sizes = [2, 256], strides = [1, 1]} : vector<18x256xf32> to vector<2x256xf32>
    %218 = arith.addf %216, %217 : vector<2x256xf32>
    %219 = vector.extract_strided_slice %218 {offsets = [0, 0], sizes = [2, 192], strides = [1, 1]} : vector<2x256xf32> to vector<2x192xf32>
    %220 = arith.negf %219 : vector<2x192xf32>
    %221 = math.exp %220 : vector<2x192xf32>
    %cst_23 = arith.constant 1.000000e+00 : f32
    %222 = vector.broadcast %cst_23 : f32 to vector<2x192xf32>
    %223 = arith.addf %222, %221 : vector<2x192xf32>
    %224 = arith.divf %222, %223 : vector<2x192xf32>
    %225 = vector.extract_strided_slice %218 {offsets = [0, 192], sizes = [2, 64], strides = [1, 1]} : vector<2x256xf32> to vector<2x64xf32>
    %226 = math.tanh %225 : vector<2x64xf32>
    %227 = vector.extract_strided_slice %224 {offsets = [0, 0], sizes = [2, 32], strides = [1, 1]} : vector<2x192xf32> to vector<2x32xf32>
    %228 = vector.extract_strided_slice %224 {offsets = [0, 32], sizes = [2, 32], strides = [1, 1]} : vector<2x192xf32> to vector<2x32xf32>
    %229 = vector.extract_strided_slice %224 {offsets = [0, 64], sizes = [2, 32], strides = [1, 1]} : vector<2x192xf32> to vector<2x32xf32>
    %230 = vector.extract_strided_slice %224 {offsets = [0, 96], sizes = [2, 32], strides = [1, 1]} : vector<2x192xf32> to vector<2x32xf32>
    %231 = vector.extract_strided_slice %224 {offsets = [0, 128], sizes = [2, 32], strides = [1, 1]} : vector<2x192xf32> to vector<2x32xf32>
    %232 = vector.extract_strided_slice %224 {offsets = [0, 160], sizes = [2, 32], strides = [1, 1]} : vector<2x192xf32> to vector<2x32xf32>
    %233 = vector.extract_strided_slice %226 {offsets = [0, 0], sizes = [2, 32], strides = [1, 1]} : vector<2x64xf32> to vector<2x32xf32>
    %234 = vector.extract_strided_slice %226 {offsets = [0, 32], sizes = [2, 32], strides = [1, 1]} : vector<2x64xf32> to vector<2x32xf32>
    %235 = arith.mulf %228, %208 : vector<2x32xf32>
    %236 = arith.mulf %227, %233 : vector<2x32xf32>
    %237 = arith.addf %235, %236 : vector<2x32xf32>
    %238 = arith.mulf %231, %214 : vector<2x32xf32>
    %239 = arith.mulf %230, %234 : vector<2x32xf32>
    %240 = arith.addf %238, %239 : vector<2x32xf32>
    %241 = tpu.concatenate %237, %240 in 1 : vector<2x32xf32>, vector<2x32xf32> -> vector<2x64xf32>
    %242 = math.tanh %241 : vector<2x64xf32>
    %243 = vector.extract_strided_slice %242 {offsets = [0, 0], sizes = [2, 32], strides = [1, 1]} : vector<2x64xf32> to vector<2x32xf32>
    %244 = arith.mulf %229, %243 : vector<2x32xf32>
    %245 = vector.extract_strided_slice %242 {offsets = [0, 32], sizes = [2, 32], strides = [1, 1]} : vector<2x64xf32> to vector<2x32xf32>
    %246 = arith.mulf %232, %245 : vector<2x32xf32>
    %247 = vector.extract_strided_slice %10 {offsets = [4, 0, 0], sizes = [1, 2, 32], strides = [1, 1, 1]} : vector<9x2x32xi1> to vector<1x2x32xi1>
    %248 = vector.shape_cast %247 : vector<1x2x32xi1> to vector<2x32xi1>
    %249 = arith.select %248, %244, %205 : vector<2x32xi1>, vector<2x32xf32>
    %250 = vector.extract_strided_slice %10 {offsets = [4, 0, 0], sizes = [1, 2, 32], strides = [1, 1, 1]} : vector<9x2x32xi1> to vector<1x2x32xi1>
    %251 = vector.shape_cast %250 : vector<1x2x32xi1> to vector<2x32xi1>
    %252 = arith.select %251, %237, %208 : vector<2x32xi1>, vector<2x32xf32>
    %253 = vector.extract_strided_slice %10 {offsets = [5, 0, 0], sizes = [1, 2, 32], strides = [1, 1, 1]} : vector<9x2x32xi1> to vector<1x2x32xi1>
    %254 = vector.shape_cast %253 : vector<1x2x32xi1> to vector<2x32xi1>
    %255 = arith.select %254, %246, %211 : vector<2x32xi1>, vector<2x32xf32>
    %256 = vector.extract_strided_slice %10 {offsets = [5, 0, 0], sizes = [1, 2, 32], strides = [1, 1, 1]} : vector<9x2x32xi1> to vector<1x2x32xi1>
    %257 = vector.shape_cast %256 : vector<1x2x32xi1> to vector<2x32xi1>
    %258 = arith.select %257, %240, %214 : vector<2x32xi1>, vector<2x32xf32>
    %259 = tpu.concatenate %246, %249 in 1 : vector<2x32xf32>, vector<2x32xf32> -> vector<2x64xf32>
    %cst_24 = arith.constant dense<0.000000e+00> : vector<2x256xf32>
    %260 = tpu.matmul %259, %11, %cst_24 {dimension_numbers = #tpu.dot_dimension_numbers<[1], [0], [0], [1], [0, 0, 1, 1], [], []>} : vector<2x64xf32>, vector<64x256xf32>, vector<2x256xf32> -> vector<2x256xf32>
    %261 = vector.extract_strided_slice %5 {offsets = [12, 0], sizes = [2, 256], strides = [1, 1]} : vector<18x256xf32> to vector<2x256xf32>
    %262 = arith.addf %260, %261 : vector<2x256xf32>
    %263 = vector.extract_strided_slice %262 {offsets = [0, 0], sizes = [2, 192], strides = [1, 1]} : vector<2x256xf32> to vector<2x192xf32>
    %264 = arith.negf %263 : vector<2x192xf32>
    %265 = math.exp %264 : vector<2x192xf32>
    %cst_25 = arith.constant 1.000000e+00 : f32
    %266 = vector.broadcast %cst_25 : f32 to vector<2x192xf32>
    %267 = arith.addf %266, %265 : vector<2x192xf32>
    %268 = arith.divf %266, %267 : vector<2x192xf32>
    %269 = vector.extract_strided_slice %262 {offsets = [0, 192], sizes = [2, 64], strides = [1, 1]} : vector<2x256xf32> to vector<2x64xf32>
    %270 = math.tanh %269 : vector<2x64xf32>
    %271 = vector.extract_strided_slice %268 {offsets = [0, 0], sizes = [2, 32], strides = [1, 1]} : vector<2x192xf32> to vector<2x32xf32>
    %272 = vector.extract_strided_slice %268 {offsets = [0, 32], sizes = [2, 32], strides = [1, 1]} : vector<2x192xf32> to vector<2x32xf32>
    %273 = vector.extract_strided_slice %268 {offsets = [0, 64], sizes = [2, 32], strides = [1, 1]} : vector<2x192xf32> to vector<2x32xf32>
    %274 = vector.extract_strided_slice %268 {offsets = [0, 96], sizes = [2, 32], strides = [1, 1]} : vector<2x192xf32> to vector<2x32xf32>
    %275 = vector.extract_strided_slice %268 {offsets = [0, 128], sizes = [2, 32], strides = [1, 1]} : vector<2x192xf32> to vector<2x32xf32>
    %276 = vector.extract_strided_slice %268 {offsets = [0, 160], sizes = [2, 32], strides = [1, 1]} : vector<2x192xf32> to vector<2x32xf32>
    %277 = vector.extract_strided_slice %270 {offsets = [0, 0], sizes = [2, 32], strides = [1, 1]} : vector<2x64xf32> to vector<2x32xf32>
    %278 = vector.extract_strided_slice %270 {offsets = [0, 32], sizes = [2, 32], strides = [1, 1]} : vector<2x64xf32> to vector<2x32xf32>
    %279 = arith.mulf %272, %252 : vector<2x32xf32>
    %280 = arith.mulf %271, %277 : vector<2x32xf32>
    %281 = arith.addf %279, %280 : vector<2x32xf32>
    %282 = arith.mulf %275, %258 : vector<2x32xf32>
    %283 = arith.mulf %274, %278 : vector<2x32xf32>
    %284 = arith.addf %282, %283 : vector<2x32xf32>
    %285 = tpu.concatenate %281, %284 in 1 : vector<2x32xf32>, vector<2x32xf32> -> vector<2x64xf32>
    %286 = math.tanh %285 : vector<2x64xf32>
    %287 = vector.extract_strided_slice %286 {offsets = [0, 0], sizes = [2, 32], strides = [1, 1]} : vector<2x64xf32> to vector<2x32xf32>
    %288 = arith.mulf %273, %287 : vector<2x32xf32>
    %289 = vector.extract_strided_slice %286 {offsets = [0, 32], sizes = [2, 32], strides = [1, 1]} : vector<2x64xf32> to vector<2x32xf32>
    %290 = arith.mulf %276, %289 : vector<2x32xf32>
    %291 = vector.extract_strided_slice %10 {offsets = [5, 0, 0], sizes = [1, 2, 32], strides = [1, 1, 1]} : vector<9x2x32xi1> to vector<1x2x32xi1>
    %292 = vector.shape_cast %291 : vector<1x2x32xi1> to vector<2x32xi1>
    %293 = arith.select %292, %288, %249 : vector<2x32xi1>, vector<2x32xf32>
    %294 = vector.extract_strided_slice %10 {offsets = [5, 0, 0], sizes = [1, 2, 32], strides = [1, 1, 1]} : vector<9x2x32xi1> to vector<1x2x32xi1>
    %295 = vector.shape_cast %294 : vector<1x2x32xi1> to vector<2x32xi1>
    %296 = arith.select %295, %281, %252 : vector<2x32xi1>, vector<2x32xf32>
    %297 = vector.extract_strided_slice %10 {offsets = [6, 0, 0], sizes = [1, 2, 32], strides = [1, 1, 1]} : vector<9x2x32xi1> to vector<1x2x32xi1>
    %298 = vector.shape_cast %297 : vector<1x2x32xi1> to vector<2x32xi1>
    %299 = arith.select %298, %290, %255 : vector<2x32xi1>, vector<2x32xf32>
    %300 = vector.extract_strided_slice %10 {offsets = [6, 0, 0], sizes = [1, 2, 32], strides = [1, 1, 1]} : vector<9x2x32xi1> to vector<1x2x32xi1>
    %301 = vector.shape_cast %300 : vector<1x2x32xi1> to vector<2x32xi1>
    %302 = arith.select %301, %284, %258 : vector<2x32xi1>, vector<2x32xf32>
    %303 = tpu.concatenate %290, %293 in 1 : vector<2x32xf32>, vector<2x32xf32> -> vector<2x64xf32>
    %cst_26 = arith.constant dense<0.000000e+00> : vector<2x256xf32>
    %304 = tpu.matmul %303, %11, %cst_26 {dimension_numbers = #tpu.dot_dimension_numbers<[1], [0], [0], [1], [0, 0, 1, 1], [], []>} : vector<2x64xf32>, vector<64x256xf32>, vector<2x256xf32> -> vector<2x256xf32>
    %305 = vector.extract_strided_slice %5 {offsets = [14, 0], sizes = [2, 256], strides = [1, 1]} : vector<18x256xf32> to vector<2x256xf32>
    %306 = arith.addf %304, %305 : vector<2x256xf32>
    %307 = vector.extract_strided_slice %306 {offsets = [0, 0], sizes = [2, 192], strides = [1, 1]} : vector<2x256xf32> to vector<2x192xf32>
    %308 = arith.negf %307 : vector<2x192xf32>
    %309 = math.exp %308 : vector<2x192xf32>
    %cst_27 = arith.constant 1.000000e+00 : f32
    %310 = vector.broadcast %cst_27 : f32 to vector<2x192xf32>
    %311 = arith.addf %310, %309 : vector<2x192xf32>
    %312 = arith.divf %310, %311 : vector<2x192xf32>
    %313 = vector.extract_strided_slice %306 {offsets = [0, 192], sizes = [2, 64], strides = [1, 1]} : vector<2x256xf32> to vector<2x64xf32>
    %314 = math.tanh %313 : vector<2x64xf32>
    %315 = vector.extract_strided_slice %312 {offsets = [0, 0], sizes = [2, 32], strides = [1, 1]} : vector<2x192xf32> to vector<2x32xf32>
    %316 = vector.extract_strided_slice %312 {offsets = [0, 32], sizes = [2, 32], strides = [1, 1]} : vector<2x192xf32> to vector<2x32xf32>
    %317 = vector.extract_strided_slice %312 {offsets = [0, 64], sizes = [2, 32], strides = [1, 1]} : vector<2x192xf32> to vector<2x32xf32>
    %318 = vector.extract_strided_slice %312 {offsets = [0, 96], sizes = [2, 32], strides = [1, 1]} : vector<2x192xf32> to vector<2x32xf32>
    %319 = vector.extract_strided_slice %312 {offsets = [0, 128], sizes = [2, 32], strides = [1, 1]} : vector<2x192xf32> to vector<2x32xf32>
    %320 = vector.extract_strided_slice %312 {offsets = [0, 160], sizes = [2, 32], strides = [1, 1]} : vector<2x192xf32> to vector<2x32xf32>
    %321 = vector.extract_strided_slice %314 {offsets = [0, 0], sizes = [2, 32], strides = [1, 1]} : vector<2x64xf32> to vector<2x32xf32>
    %322 = vector.extract_strided_slice %314 {offsets = [0, 32], sizes = [2, 32], strides = [1, 1]} : vector<2x64xf32> to vector<2x32xf32>
    %323 = arith.mulf %316, %296 : vector<2x32xf32>
    %324 = arith.mulf %315, %321 : vector<2x32xf32>
    %325 = arith.addf %323, %324 : vector<2x32xf32>
    %326 = arith.mulf %319, %302 : vector<2x32xf32>
    %327 = arith.mulf %318, %322 : vector<2x32xf32>
    %328 = arith.addf %326, %327 : vector<2x32xf32>
    %329 = tpu.concatenate %325, %328 in 1 : vector<2x32xf32>, vector<2x32xf32> -> vector<2x64xf32>
    %330 = math.tanh %329 : vector<2x64xf32>
    %331 = vector.extract_strided_slice %330 {offsets = [0, 0], sizes = [2, 32], strides = [1, 1]} : vector<2x64xf32> to vector<2x32xf32>
    %332 = arith.mulf %317, %331 : vector<2x32xf32>
    %333 = vector.extract_strided_slice %330 {offsets = [0, 32], sizes = [2, 32], strides = [1, 1]} : vector<2x64xf32> to vector<2x32xf32>
    %334 = arith.mulf %320, %333 : vector<2x32xf32>
    %335 = vector.extract_strided_slice %10 {offsets = [6, 0, 0], sizes = [1, 2, 32], strides = [1, 1, 1]} : vector<9x2x32xi1> to vector<1x2x32xi1>
    %336 = vector.shape_cast %335 : vector<1x2x32xi1> to vector<2x32xi1>
    %337 = arith.select %336, %332, %293 : vector<2x32xi1>, vector<2x32xf32>
    %338 = vector.extract_strided_slice %10 {offsets = [6, 0, 0], sizes = [1, 2, 32], strides = [1, 1, 1]} : vector<9x2x32xi1> to vector<1x2x32xi1>
    %339 = vector.shape_cast %338 : vector<1x2x32xi1> to vector<2x32xi1>
    %340 = arith.select %339, %325, %296 : vector<2x32xi1>, vector<2x32xf32>
    %341 = vector.extract_strided_slice %10 {offsets = [7, 0, 0], sizes = [1, 2, 32], strides = [1, 1, 1]} : vector<9x2x32xi1> to vector<1x2x32xi1>
    %342 = vector.shape_cast %341 : vector<1x2x32xi1> to vector<2x32xi1>
    %343 = arith.select %342, %334, %299 : vector<2x32xi1>, vector<2x32xf32>
    %344 = vector.extract_strided_slice %10 {offsets = [7, 0, 0], sizes = [1, 2, 32], strides = [1, 1, 1]} : vector<9x2x32xi1> to vector<1x2x32xi1>
    %345 = vector.shape_cast %344 : vector<1x2x32xi1> to vector<2x32xi1>
    %346 = arith.select %345, %328, %302 : vector<2x32xi1>, vector<2x32xf32>
    %347 = tpu.concatenate %334, %337 in 1 : vector<2x32xf32>, vector<2x32xf32> -> vector<2x64xf32>
    %cst_28 = arith.constant dense<0.000000e+00> : vector<2x256xf32>
    %348 = tpu.matmul %347, %11, %cst_28 {dimension_numbers = #tpu.dot_dimension_numbers<[1], [0], [0], [1], [0, 0, 1, 1], [], []>} : vector<2x64xf32>, vector<64x256xf32>, vector<2x256xf32> -> vector<2x256xf32>
    %349 = vector.extract_strided_slice %5 {offsets = [16, 0], sizes = [2, 256], strides = [1, 1]} : vector<18x256xf32> to vector<2x256xf32>
    %350 = arith.addf %348, %349 : vector<2x256xf32>
    %351 = vector.extract_strided_slice %350 {offsets = [0, 0], sizes = [2, 192], strides = [1, 1]} : vector<2x256xf32> to vector<2x192xf32>
    %352 = arith.negf %351 : vector<2x192xf32>
    %353 = math.exp %352 : vector<2x192xf32>
    %cst_29 = arith.constant 1.000000e+00 : f32
    %354 = vector.broadcast %cst_29 : f32 to vector<2x192xf32>
    %355 = arith.addf %354, %353 : vector<2x192xf32>
    %356 = arith.divf %354, %355 : vector<2x192xf32>
    %357 = vector.extract_strided_slice %350 {offsets = [0, 192], sizes = [2, 64], strides = [1, 1]} : vector<2x256xf32> to vector<2x64xf32>
    %358 = math.tanh %357 : vector<2x64xf32>
    %359 = vector.extract_strided_slice %356 {offsets = [0, 0], sizes = [2, 32], strides = [1, 1]} : vector<2x192xf32> to vector<2x32xf32>
    %360 = vector.extract_strided_slice %356 {offsets = [0, 32], sizes = [2, 32], strides = [1, 1]} : vector<2x192xf32> to vector<2x32xf32>
    %361 = vector.extract_strided_slice %356 {offsets = [0, 64], sizes = [2, 32], strides = [1, 1]} : vector<2x192xf32> to vector<2x32xf32>
    %362 = vector.extract_strided_slice %356 {offsets = [0, 96], sizes = [2, 32], strides = [1, 1]} : vector<2x192xf32> to vector<2x32xf32>
    %363 = vector.extract_strided_slice %356 {offsets = [0, 128], sizes = [2, 32], strides = [1, 1]} : vector<2x192xf32> to vector<2x32xf32>
    %364 = vector.extract_strided_slice %356 {offsets = [0, 160], sizes = [2, 32], strides = [1, 1]} : vector<2x192xf32> to vector<2x32xf32>
    %365 = vector.extract_strided_slice %358 {offsets = [0, 0], sizes = [2, 32], strides = [1, 1]} : vector<2x64xf32> to vector<2x32xf32>
    %366 = vector.extract_strided_slice %358 {offsets = [0, 32], sizes = [2, 32], strides = [1, 1]} : vector<2x64xf32> to vector<2x32xf32>
    %367 = arith.mulf %360, %340 : vector<2x32xf32>
    %368 = arith.mulf %359, %365 : vector<2x32xf32>
    %369 = arith.addf %367, %368 : vector<2x32xf32>
    %370 = arith.mulf %363, %346 : vector<2x32xf32>
    %371 = arith.mulf %362, %366 : vector<2x32xf32>
    %372 = arith.addf %370, %371 : vector<2x32xf32>
    %373 = tpu.concatenate %369, %372 in 1 : vector<2x32xf32>, vector<2x32xf32> -> vector<2x64xf32>
    %374 = math.tanh %373 : vector<2x64xf32>
    %375 = vector.extract_strided_slice %374 {offsets = [0, 0], sizes = [2, 32], strides = [1, 1]} : vector<2x64xf32> to vector<2x32xf32>
    %376 = arith.mulf %361, %375 : vector<2x32xf32>
    %377 = vector.extract_strided_slice %374 {offsets = [0, 32], sizes = [2, 32], strides = [1, 1]} : vector<2x64xf32> to vector<2x32xf32>
    %378 = arith.mulf %364, %377 : vector<2x32xf32>
    %379 = vector.extract_strided_slice %10 {offsets = [7, 0, 0], sizes = [1, 2, 32], strides = [1, 1, 1]} : vector<9x2x32xi1> to vector<1x2x32xi1>
    %380 = vector.shape_cast %379 : vector<1x2x32xi1> to vector<2x32xi1>
    %381 = arith.select %380, %376, %337 : vector<2x32xi1>, vector<2x32xf32>
    %382 = vector.extract_strided_slice %10 {offsets = [7, 0, 0], sizes = [1, 2, 32], strides = [1, 1, 1]} : vector<9x2x32xi1> to vector<1x2x32xi1>
    %383 = vector.shape_cast %382 : vector<1x2x32xi1> to vector<2x32xi1>
    %384 = arith.select %383, %369, %340 : vector<2x32xi1>, vector<2x32xf32>
    %385 = vector.extract_strided_slice %10 {offsets = [8, 0, 0], sizes = [1, 2, 32], strides = [1, 1, 1]} : vector<9x2x32xi1> to vector<1x2x32xi1>
    %386 = vector.shape_cast %385 : vector<1x2x32xi1> to vector<2x32xi1>
    %387 = arith.select %386, %378, %343 : vector<2x32xi1>, vector<2x32xf32>
    %388 = vector.extract_strided_slice %10 {offsets = [8, 0, 0], sizes = [1, 2, 32], strides = [1, 1, 1]} : vector<9x2x32xi1> to vector<1x2x32xi1>
    %389 = vector.shape_cast %388 : vector<1x2x32xi1> to vector<2x32xi1>
    %390 = arith.select %389, %372, %346 : vector<2x32xi1>, vector<2x32xf32>
    %391 = tpu.concatenate %387, %381, %390, %384 in 1 : vector<2x32xf32>, vector<2x32xf32>, vector<2x32xf32>, vector<2x32xf32> -> vector<2x128xf32>
    %c0_30 = arith.constant 0 : index
    %c0_31 = arith.constant 0 : index
    %392 = vector.load %arg5[%c0_30, %c0_31] : memref<2x128xf32, #tpu.memory_space<vmem>>, vector<2x128xf32>
    tpu.vector_store %arg5[%c0_30, %c0_31], %391 {strides = array<i32>} : memref<2x128xf32, #tpu.memory_space<vmem>>, vector<2x128xf32>,
    return
  }
}

</mosaic_0001>

<bundles_post_ra>
// kernel: encoder_forward.1
= control target key start
LH: loop header
LB: loop body
LE: loop exit
PB: predicated region body
PF: predicated region fallthrough
CT: control target
= control target key end

     0   :  { %10 = vsyncpa [#allocation3], 0  ;;  %s1493_s18 = smov [#allocation2]   ;;  %s2068_s0 = inlined_call_operand.vmem [shape: f32[18,8], index: 0, kind: input, shape index: {}]   ;;  %s2069_s1 = inlined_call_operand.vmem [shape: s32[2,1], index: 1, kind: input, shape index: {}]   ;;  %s2070_s2 = inlined_call_operand.vmem [shape: f32[8,256], index: 2, kind: input, shape index: {}]   ;;  %s2071_s3 = inlined_call_operand.vmem [shape: f32[1,256], index: 3, kind: input, shape index: {}]   ;;  %s2072_s4 = inlined_call_operand.hbm [shape: f32[64,256], index: 4, kind: input, shape index: {}]   ;;  %s2073_s5 = inlined_call_operand.vmem [shape: f32[2,128], index: 5, kind: output, shape index: {}]  }
   0x1   :  { %s24_s19 = sshll.u32 %s1493_s18, 4  ;;  %s25_s19 = int_to_ptr.vmem [resolvable:$true] %s24_s19 }
   0x2   :  { %s1479_s20 = scalar_lea.vmem %s25_s19, 2048  ;;  %p1484_p1 = scmp.lt.s32.totalorder %s25_s19, %s25_s19 }
   0x3   :  { %p1480_p0 = scmp.ne.s32.totalorder %s25_s19, %s1479_s20  ;;  %p1485_p2 = scmp.lt.s32.totalorder %s1479_s20, %s1479_s20 }
   0x5   :  { %p1486_p3 = por %p1485_p2, %p1484_p1 }
   0x7   :  { %p1487_p4 = pnand %p1486_p3, %p1480_p0 }
   0x9   :  { %1490 = shalt.err (!%p1487_p4)
}
   0xa   :  { %s1494_s21 = smov 256   ;;  %s1495_s22 = smov 16  }
   0xb   :  { %30 = dma.hbm_to_vmem [thread:$0]  %s2072_s4, 2048, %s25_s19, [#allocation3], %s1494_s21, %s1494_s21, %s1495_s22  }
   0xc   :  { %1491 = dma.done.wait [#allocation3], 2048  }
   0xd   :  { %1492 = vsyncadd [#allocation3], 4294965248  ;;  %v1496_v0 = vmov 0.0   ;;  %v38_v1 = vld [vmem:[%s2070_s2 + $0x8] sm:$0xff]  ;;  %v37_v2 = vld [vmem:[%s2070_s2] sm:$0xff]  ;;  %vm51_vm0 = vcmask 64512   ;;  %v41_v4 = vlaneseq }
   0xe   :  { %125 = vmatprep.mubr.f32.mxu0 %v1496_v0  ;;  %281 = vmatprep.mubr.f32.mxu1 %v1496_v0  ;;  %v34_v3 = vld [vmem:[%s2068_s0] sm:$0xff]  ;;  %s1497_s2 = smov 32   ;;  %v1498_v21 = vmov 0   ;;  %v1567_v30 = vld [vmem:[#allocation2 + $0x78] sm:$0xff]  ;;  %v1569_v31 = vld [vmem:[#allocation2 + $0x70] sm:$0xff]  ;;  %vm205_vm1 = vcmask 261120  }
   0xf   :  { %91 = vmatprep.subr.mxu0 %v38_v1  ;;  %v42_v5 = vshrl.u32 %v41_v4, 7  ;;  %v39_v7 = vld [vmem:[%s2071_s3] sm:$0x3]  ;;  %1362 = vset.pattern.permute.xlu0 %v1498_v21  ;;  %v1571_v32 = vld [vmem:[#allocation2 + $0x68] sm:$0xff]  ;;  %v1581_v35 = vld [vmem:[#allocation2 + $0x58] sm:$0xff]  ;;  %vm213_vm2 = vcmask 523264  }
  0x10   :  { %92 = vmatpush1.msra.mxu0 %v37_v2  ;;  %233 = vmatprep.subr.mxu1 %v1567_v30  ;;  %v1575_v33 = vld [vmem:[#allocation2 + $0x60] sm:$0xff]  ;;  %v1585_v36 = vld [vmem:[#allocation2 + $0x50] sm:$0xff]  ;;  %v1589_v37 = vld [vmem:[#allocation2 + $0x48] sm:$0xff]  ;;  %s1500_s8 = smov 64   ;;  %vm1317_vm12 = vcmask 785408  }
  0x11   :  { %1325 = vmatmul.mubr.msk.f32.vlgmr.msra.gmra.mxu0 %vm51_vm0, %v34_v3  ;;  %v43_v6 = vsub.s32 0, %v42_v5  ;;  %v47_v12 = vsub.s32 1, %v42_v5  ;;  %v144_v34 = vld [vmem:[%s2069_s1] sm:$0x3]  ;;  %234 = vmatpush1.msra.mxu1 %v1569_v31  ;;  %v1596_v39 = vld [vmem:[#allocation2 + $0x38] sm:$0xff]  ;;  %v1600_v40 = vld [vmem:[#allocation2 + $0x30] sm:$0xff] }
  0x12   :  { %131 = vmatprep.mubr.f32.mxu0 %v1496_v0  ;;  %371 = vmatprep.subr.mxu0 %v1567_v30  ;;  %v1593_v38 = vld [vmem:[#allocation2 + $0x40] sm:$0xff]  ;;  %v1604_v41 = vld [vmem:[#allocation2 + $0x28] sm:$0xff]  ;;  %v1612_v43 = vld [vmem:[#allocation2 + $0x18] sm:$0xff]  ;;  %s1499_s1 = smov 96  }
  0x13   :  { %v1550_v8 = vrot.slane %v39_v7, %v43_v6  ;;  %v1556_v13 = vrot.slane %v39_v7, %v47_v12  ;;  %235 = vmatprep.subr.mxu1 %v1571_v32  ;;  %372 = vmatpush1.msra.mxu0 %v1569_v31  ;;  %v1608_v42 = vld [vmem:[#allocation2 + $0x20] sm:$0xff]  ;;  %v1616_v44 = vld [vmem:[#allocation2 + $0x10] sm:$0xff]  ;;  %v1620_v45 = vld [vmem:[#allocation2 + $0x8] sm:$0xff] }
  0x14   :  { %236 = vmatpush1.msra.mxu1 %v1575_v33  ;;  %373 = vmatprep.subr.mxu0 %v1571_v32  ;;  %v1631_v46 = vld [vmem:[#allocation2] sm:$0xff]  ;;  %v35_v21 = vld [vmem:[%s2068_s0 + $0x8] sm:$0xff] }
  0x15   :  { %237 = vmatprep.subr.mxu1 %v1581_v35  ;;  %374 = vmatpush1.msra.mxu0 %v1575_v33 }
  0x16   :  { %238 = vmatpush1.msra.mxu1 %v1585_v36  ;;  %375 = vmatprep.subr.mxu0 %v1581_v35 }
  0x17   :  { %239 = vmatprep.subr.mxu1 %v1589_v37  ;;  %376 = vmatpush1.msra.mxu0 %v1585_v36 }
  0x18   :  { %240 = vmatpush1.msra.mxu1 %v1593_v38  ;;  %377 = vmatprep.subr.mxu0 %v1589_v37 }
  0x19   :  { %241 = vmatprep.subr.mxu1 %v1596_v39  ;;  %378 = vmatpush1.msra.mxu0 %v1593_v38 }
  0x1a   :  { %242 = vmatpush1.msra.mxu1 %v1600_v40  ;;  %379 = vmatprep.subr.mxu0 %v1596_v39 }
  0x1b   :  { %243 = vmatprep.subr.mxu1 %v1604_v41  ;;  %380 = vmatpush1.msra.mxu0 %v1600_v40 }
  0x1c   :  { %244 = vmatpush1.msra.mxu1 %v1608_v42  ;;  %381 = vmatprep.subr.mxu0 %v1604_v41 }
  0x1d   :  { %245 = vmatprep.subr.mxu1 %v1612_v43  ;;  %382 = vmatpush1.msra.mxu0 %v1608_v42 }
  0x1e   :  { %246 = vmatpush1.msra.mxu1 %v1616_v44  ;;  %383 = vmatprep.subr.mxu0 %v1612_v43 }
  0x1f   :  { %247 = vmatprep.subr.mxu1 %v1620_v45  ;;  %384 = vmatpush1.msra.mxu0 %v1616_v44 }
  0x20   :  { %385 = vmatprep.subr.mxu0 %v1620_v45  ;;  %248 = vmatpush1.msra.mxu1 %v1631_v46 }
  0x21   :  { %386 = vmatpush1.msra.mxu0 %v1631_v46  ;;  %509 = vmatprep.subr.mxu1 %v1567_v30 }
  0x22   :  { %643 = vmatprep.subr.mxu0 %v1567_v30  ;;  %1326 = vmatmul.mubr.msk.f32.gmra.mxu0 %vm51_vm0, %v35_v21 }
  0x23   :  { %137 = vmatprep.mubr.f32.mxu0 %v1496_v0 }
  0xd1   :  { %v127_v9 = vpop.f32.mrf.mxu0 }
  0xd2   :  { %v1553_v10 = vadd.f32 %v127_v9, %v1550_v8 }
  0xd3   :  { %v129_v14 = vpop.f32.mrf.mxu0 }
  0xd4   :  { %v1328_v11 = vmul.f32 -1.442695, %v1553_v10  ;;  %v1559_v15 = vadd.f32 %v129_v14, %v1556_v13  ;;  %v209_v51 = vrot.slane %v1553_v10, 2 }
  0xd6   :  { %1363 = vpow2.f32 %v1328_v11  ;;  %v1329_v22 = vmul.f32 -1.442695, %v1559_v15  ;;  %v210_v54 = vrot.slane %v1559_v15, 2 }
  0xd7   :  { %1365 = vtanh.f32 %v1559_v15 }
  0xe3   :  { %v1364_v16 = vpop.eup %1363 }
  0xe4   :  { %v179_v17 = vadd.f32 1.0, %v1364_v16  ;;  %v1366_v18 = vpop.eup %1365 }
  0xe6   :  { %1367 = vrcp.f32 %v179_v17 }
  0xe7   :  { %1369 = vpow2.f32 %v1329_v22  ;;  %v36_v22 = vld [vmem:[%s2068_s0 + $0x10] sm:$0x3] }
  0xe8   :  { %1327 = vmatmul.mubr.msk.f32.gmra.mxu0 %vm51_vm0, %v36_v22 }
  0xe9   :  { %419 = vmatprep.mubr.f32.mxu0 %v1496_v0 }
  0xf3   :  { %v1368_v19 = vpop.eup %1367 }
  0xf4   :  { %v187_v20 = vmul.f32 %v1368_v19, %v1366_v18  ;;  %v1370_v23 = vpop.eup %1369 }
  0xf5   :  { %v180_v24 = vadd.f32 1.0, %v1370_v23 }
  0xf6   :  { %189 = vrot.lane.b32.xlu0 %v187_v20, %s1497_s2 }
  0xf7   :  { %1371 = vrcp.f32 %v180_v24 }
 0x104   :  { %v1372_v25 = vpop.eup %1371 }
 0x105   :  { %v186_v26 = vmul.f32 0.0, %v1372_v25 }
 0x168   :  { %v190_v27 = vpop.permute.xlu0 %189 }
 0x169   :  { %v1564_v28 = vadd.f32 %v190_v27, %v186_v26 }
 0x16b   :  { %1373 = vtanh.f32 %v1564_v28 }
 0x178   :  { %v1374_v29 = vpop.eup %1373 }
 0x179   :  { %195 = vrot.lane.b32.xlu0 %v1374_v29, %s1497_s2 }
 0x17d   :  { %146 = vperm.xlu0 %1362, %v144_v34  }
 0x1eb   :  { %v196_v47 = vpop.permute.xlu0 %195 }
 0x1ec   :  { %v1637_v48 = vmul.f32 %v1372_v25, %v196_v47 }
 0x1ee   :  { %202 = vrot.lane.b32.xlu1 %v1637_v48, %s1499_s1 }
 0x1f8   :  { %v1665_v5 = vpop.permute.xlu0 %146 }
 0x1f9   :  { %vm148_vm3 = vcmp.gt.s32.totalorder %v1665_v5, 0  ;;  %vm149_vm4 = vcmp.gt.s32.totalorder %v1665_v5, 1  ;;  %vm150_vm5 = vcmp.gt.s32.totalorder %v1665_v5, 2  ;;  %vm151_vm6 = vcmp.gt.s32.totalorder %v1665_v5, 3 }
 0x1fa   :  { %v1673_v12 = vsel %vm148_vm3, %v1564_v28, 0.0  ;;  %v199_v25 = vsel %vm148_vm3, %v1637_v48, 0.0  ;;  %vm152_vm7 = vcmp.gt.s32.totalorder %v1665_v5, 4  ;;  %vm153_vm8 = vcmp.gt.s32.totalorder %v1665_v5, 5 }
 0x1fb   :  { %vm154_vm9 = vcmp.gt.s32.totalorder %v1665_v5, 6  ;;  %vm155_vm10 = vcmp.gt.s32.totalorder %v1665_v5, 7  ;;  %vm156_vm11 = vcmp.gt.s32.totalorder %v1665_v5, 8 }
 0x260   :  { %v203_v49 = vpop.permute.xlu1 %202 }
 0x261   :  { %v206_v50 = vsel %vm205_vm1, %v203_v49, 0.0  ;;  %v1728_v49 = vpop.f32.mrf.mxu0 }
 0x262   :  { %1330 = vmatmul.mubr.msk.f32.vlgmr.msra.gmra.mxu1 %vm213_vm2, %v206_v50 }
 0x263   :  { %510 = vmatpush1.msra.mxu1 %v1569_v31  ;;  %557 = vmatprep.mubr.f32.mxu1 %v1496_v0  ;;  %v1730_v50 = vpop.f32.mrf.mxu0 }
 0x264   :  { %511 = vmatprep.subr.mxu1 %v1571_v32 }
 0x265   :  { %512 = vmatpush1.msra.mxu1 %v1575_v33 }
 0x266   :  { %513 = vmatprep.subr.mxu1 %v1581_v35 }
 0x267   :  { %514 = vmatpush1.msra.mxu1 %v1585_v36 }
 0x268   :  { %515 = vmatprep.subr.mxu1 %v1589_v37 }
 0x269   :  { %516 = vmatpush1.msra.mxu1 %v1593_v38 }
 0x26a   :  { %517 = vmatprep.subr.mxu1 %v1596_v39 }
 0x26b   :  { %518 = vmatpush1.msra.mxu1 %v1600_v40 }
 0x26c   :  { %519 = vmatprep.subr.mxu1 %v1604_v41 }
 0x26d   :  { %520 = vmatpush1.msra.mxu1 %v1608_v42 }
 0x26e   :  { %521 = vmatprep.subr.mxu1 %v1612_v43 }
 0x26f   :  { %522 = vmatpush1.msra.mxu1 %v1616_v44 }
 0x270   :  { %523 = vmatprep.subr.mxu1 %v1620_v45 }
 0x271   :  { %524 = vmatpush1.msra.mxu1 %v1631_v46 }
 0x272   :  { %783 = vmatprep.subr.mxu1 %v1567_v30 }
 0x322   :  { %v283_v52 = vpop.f32.mrf.mxu1 }
 0x323   :  { %v284_v53 = vadd.f32 %v283_v52, %v209_v51  ;;  %v1732_v51 = vpop.f32.mrf.mxu0 }
 0x324   :  { %v285_v55 = vpop.f32.mrf.mxu1 }
 0x325   :  { %v286_v56 = vadd.f32 %v285_v55, %v210_v54  ;;  %v1331_v58 = vmul.f32 -1.442695, %v284_v53  ;;  %v1734_v52 = vpop.f32.mrf.mxu0  ;;  %v348_v53 = vrot.slane %v1553_v10, 4 }
 0x327   :  { %1375 = vtanh.f32 %v286_v56  ;;  %v1332_v2 = vmul.f32 -1.442695, %v286_v56  ;;  %v349_v56 = vrot.slane %v1559_v15, 4 }
 0x328   :  { %1377 = vpow2.f32 %v1331_v58 }
 0x334   :  { %v1376_v57 = vpop.eup %1375 }
 0x335   :  { %303 = vrot.lane.b32.xlu1 %v1376_v57, %s1500_s8  ;;  %v1378_v59 = vpop.eup %1377 }
 0x336   :  { %v294_v60 = vadd.f32 1.0, %v1378_v59 }
 0x338   :  { %1379 = vrcp.f32 %v294_v60 }
 0x339   :  { %1381 = vpow2.f32 %v1332_v2 }
 0x345   :  { %v1380_v61 = vpop.eup %1379 }
 0x346   :  { %v313_v1 = vmul.f32 %v1380_v61, %v1376_v57  ;;  %v1382_v3 = vpop.eup %1381  ;;  %v301_v6 = vmul.f32 0.0, %v1380_v61 }
 0x347   :  { %v295_v4 = vadd.f32 1.0, %v1382_v3 }
 0x349   :  { %1383 = vrcp.f32 %v295_v4 }
 0x356   :  { %v1384_v7 = vpop.eup %1383 }
 0x357   :  { %v312_v14 = vmul.f32 %v1384_v7, %v1673_v12 }
 0x3a7   :  { %v304_v62 = vpop.permute.xlu1 %303 }
 0x3a8   :  { %v306_v63 = vmul.f32 %v1380_v61, %v304_v62 }
 0x3aa   :  { %308 = vrot.lane.b32.xlu1 %v306_v63, %s1497_s2 }
 0x3ae   :  { %315 = vrot.lane.b32.xlu1 %v313_v1, %s1497_s2 }
 0x41c   :  { %v309_v9 = vpop.permute.xlu1 %308 }
 0x41d   :  { %v1668_v11 = vadd.f32 %v309_v9, %v301_v6 }
 0x41f   :  { %320 = vrot.lane.b32.xlu0 %v1668_v11, %s1499_s1 }
 0x420   :  { %v316_v16 = vpop.permute.xlu1 %315 }
 0x421   :  { %v1678_v17 = vadd.f32 %v316_v16, %v312_v14 }
 0x423   :  { %324 = vrot.lane.b32.xlu1 %v1678_v17, %s1497_s2  ;;  %v1745_v14 = vsel %vm149_vm4, %v1678_v17, %v1673_v12 }
 0x491   :  { %v321_v18 = vpop.permute.xlu0 %320 }
 0x495   :  { %v325_v19 = vpop.permute.xlu1 %324 }
 0x496   :  { %v327_v20 = vsel %vm205_vm1, %v321_v18, %v325_v19 }
 0x497   :  { %1385 = vtanh.f32 %v327_v20  ;;  %v1755_v20 = vsel %vm148_vm3, %v1668_v11, 0.0 }
 0x4a4   :  { %v1386_v23 = vpop.eup %1385 }
 0x4a5   :  { %330 = vrot.lane.b32.xlu0 %v1386_v23, %s1500_s8  ;;  %v334_v24 = vmul.f32 %v1386_v23, %v1384_v7 }
 0x4a7   :  { %340 = vrot.lane.b32.xlu1 %v334_v24, %s1499_s1  ;;  %v1701_v26 = vsel %vm149_vm4, %v334_v24, %v199_v25 }
 0x517   :  { %v331_v27 = vpop.permute.xlu0 %330 }
 0x518   :  { %v333_v28 = vmul.f32 %v1380_v61, %v331_v27 }
 0x519   :  { %v341_v34 = vpop.permute.xlu1 %340 }
 0x51a   :  { %v1705_v29 = vsel %vm148_vm3, %v333_v28, 0.0 }
 0x51b   :  { %344 = vrot.lane.b32.xlu0 %v1705_v29, %s1499_s1 }
 0x58d   :  { %v345_v47 = vpop.permute.xlu0 %344 }
 0x58e   :  { %v347_v48 = vsel %vm205_vm1, %v341_v34, %v345_v47 }
 0x58f   :  { %1333 = vmatmul.mubr.msk.f32.vlgmr.msra.gmra.mxu0 %vm213_vm2, %v347_v48 }
 0x590   :  { %644 = vmatpush1.msra.mxu0 %v1569_v31  ;;  %691 = vmatprep.mubr.f32.mxu0 %v1496_v0 }
 0x591   :  { %645 = vmatprep.subr.mxu0 %v1571_v32 }
 0x592   :  { %646 = vmatpush1.msra.mxu0 %v1575_v33 }
 0x593   :  { %647 = vmatprep.subr.mxu0 %v1581_v35 }
 0x594   :  { %648 = vmatpush1.msra.mxu0 %v1585_v36 }
 0x595   :  { %649 = vmatprep.subr.mxu0 %v1589_v37 }
 0x596   :  { %650 = vmatpush1.msra.mxu0 %v1593_v38 }
 0x597   :  { %651 = vmatprep.subr.mxu0 %v1596_v39 }
 0x598   :  { %652 = vmatpush1.msra.mxu0 %v1600_v40 }
 0x599   :  { %653 = vmatprep.subr.mxu0 %v1604_v41 }
 0x59a   :  { %654 = vmatpush1.msra.mxu0 %v1608_v42 }
 0x59b   :  { %655 = vmatprep.subr.mxu0 %v1612_v43 }
 0x59c   :  { %656 = vmatpush1.msra.mxu0 %v1616_v44 }
 0x59d   :  { %657 = vmatprep.subr.mxu0 %v1620_v45 }
 0x59e   :  { %658 = vmatpush1.msra.mxu0 %v1631_v46 }
 0x59f   :  { %921 = vmatprep.subr.mxu0 %v1567_v30 }
 0x64f   :  { %v421_v54 = vpop.f32.mrf.mxu0 }
 0x650   :  { %v422_v55 = vadd.f32 %v421_v54, %v348_v53 }
 0x651   :  { %v423_v57 = vpop.f32.mrf.mxu0 }
 0x652   :  { %v1334_v58 = vmul.f32 -1.442695, %v422_v55  ;;  %v424_v59 = vadd.f32 %v423_v57, %v349_v56  ;;  %v487_v56 = vrot.slane %v1559_v15, 6 }
 0x654   :  { %1387 = vpow2.f32 %v1334_v58  ;;  %v1335_v2 = vmul.f32 -1.442695, %v424_v59 }
 0x655   :  { %1389 = vtanh.f32 %v424_v59 }
 0x661   :  { %v1388_v60 = vpop.eup %1387 }
 0x662   :  { %v1390_v61 = vpop.eup %1389  ;;  %v432_v62 = vadd.f32 1.0, %v1388_v60 }
 0x663   :  { %441 = vrot.lane.b32.xlu1 %v1390_v61, %s1500_s8 }
 0x664   :  { %1391 = vrcp.f32 %v432_v62 }
 0x665   :  { %1393 = vpow2.f32 %v1335_v2 }
 0x671   :  { %v1392_v63 = vpop.eup %1391 }
 0x672   :  { %v451_v1 = vmul.f32 %v1392_v63, %v1390_v61  ;;  %v1394_v3 = vpop.eup %1393  ;;  %v439_v21 = vmul.f32 %v1392_v63, %v1755_v20 }
 0x673   :  { %v433_v4 = vadd.f32 1.0, %v1394_v3 }
 0x674   :  { %453 = vrot.lane.b32.xlu1 %v451_v1, %s1497_s2 }
 0x675   :  { %1395 = vrcp.f32 %v433_v4 }
 0x682   :  { %v1396_v9 = vpop.eup %1395 }
 0x683   :  { %v450_v16 = vmul.f32 %v1396_v9, %v1745_v14 }
 0x6d5   :  { %v442_v6 = vpop.permute.xlu1 %441 }
 0x6d6   :  { %v444_v7 = vmul.f32 %v1392_v63, %v442_v6 }
 0x6d8   :  { %446 = vrot.lane.b32.xlu0 %v444_v7, %s1497_s2 }
 0x6e6   :  { %v454_v18 = vpop.permute.xlu1 %453 }
 0x6e7   :  { %v1748_v19 = vadd.f32 %v454_v18, %v450_v16 }
 0x6e9   :  { %462 = vrot.lane.b32.xlu1 %v1748_v19, %s1497_s2  ;;  %v1806_v7 = vsel %vm150_vm5, %v1748_v19, %v1745_v14 }
 0x74a   :  { %v447_v22 = vpop.permute.xlu0 %446 }
 0x74b   :  { %v1758_v23 = vadd.f32 %v447_v22, %v439_v21 }
 0x74d   :  { %458 = vrot.lane.b32.xlu0 %v1758_v23, %s1499_s1  ;;  %v1817_v21 = vsel %vm149_vm4, %v1758_v23, %v1755_v20 }
 0x75b   :  { %v463_v12 = vpop.permute.xlu1 %462 }
 0x7bf   :  { %v459_v17 = vpop.permute.xlu0 %458 }
 0x7c0   :  { %v465_v24 = vsel %vm205_vm1, %v459_v17, %v463_v12 }
 0x7c1   :  { %1397 = vtanh.f32 %v465_v24 }
 0x7ce   :  { %v1398_v25 = vpop.eup %1397 }
 0x7cf   :  { %468 = vrot.lane.b32.xlu0 %v1398_v25, %s1500_s8  ;;  %v472_v27 = vmul.f32 %v1398_v25, %v1396_v9 }
 0x7d1   :  { %478 = vrot.lane.b32.xlu1 %v472_v27, %s1499_s1  ;;  %v1769_v11 = vsel %vm150_vm5, %v472_v27, %v1701_v26  ;;  %v486_v26 = vrot.slane %v1553_v10, 6 }
 0x841   :  { %v469_v28 = vpop.permute.xlu0 %468 }
 0x842   :  { %v471_v34 = vmul.f32 %v1392_v63, %v469_v28 }
 0x843   :  { %v479_v48 = vpop.permute.xlu1 %478 }
 0x844   :  { %v1774_v47 = vsel %vm149_vm4, %v471_v34, %v1705_v29 }
 0x845   :  { %482 = vrot.lane.b32.xlu0 %v1774_v47, %s1499_s1 }
 0x8b7   :  { %v483_v53 = vpop.permute.xlu0 %482 }
 0x8b8   :  { %v485_v54 = vsel %vm205_vm1, %v479_v48, %v483_v53 }
 0x8b9   :  { %1336 = vmatmul.mubr.msk.f32.vlgmr.msra.gmra.mxu1 %vm213_vm2, %v485_v54 }
 0x8ba   :  { %784 = vmatpush1.msra.mxu1 %v1569_v31  ;;  %831 = vmatprep.mubr.f32.mxu1 %v1496_v0 }
 0x8bb   :  { %785 = vmatprep.subr.mxu1 %v1571_v32 }
 0x8bc   :  { %786 = vmatpush1.msra.mxu1 %v1575_v33 }
 0x8bd   :  { %787 = vmatprep.subr.mxu1 %v1581_v35 }
 0x8be   :  { %788 = vmatpush1.msra.mxu1 %v1585_v36 }
 0x8bf   :  { %789 = vmatprep.subr.mxu1 %v1589_v37 }
 0x8c0   :  { %790 = vmatpush1.msra.mxu1 %v1593_v38 }
 0x8c1   :  { %791 = vmatprep.subr.mxu1 %v1596_v39 }
 0x8c2   :  { %792 = vmatpush1.msra.mxu1 %v1600_v40 }
 0x8c3   :  { %793 = vmatprep.subr.mxu1 %v1604_v41 }
 0x8c4   :  { %794 = vmatpush1.msra.mxu1 %v1608_v42 }
 0x8c5   :  { %795 = vmatprep.subr.mxu1 %v1612_v43 }
 0x8c6   :  { %796 = vmatpush1.msra.mxu1 %v1616_v44 }
 0x8c7   :  { %797 = vmatprep.subr.mxu1 %v1620_v45 }
 0x8c8   :  { %798 = vmatpush1.msra.mxu1 %v1631_v46 }
 0x8c9   :  { %1059 = vmatprep.subr.mxu1 %v1567_v30 }
 0x979   :  { %v559_v29 = vpop.f32.mrf.mxu1 }
 0x97a   :  { %v560_v55 = vadd.f32 %v559_v29, %v486_v26  ;;  %v1865_v26 = vadd.f32 %v1730_v50, %v1556_v13 }
 0x97b   :  { %v561_v57 = vpop.f32.mrf.mxu1 }
 0x97c   :  { %v1337_v58 = vmul.f32 -1.442695, %v560_v55  ;;  %v562_v59 = vadd.f32 %v561_v57, %v487_v56 }
 0x97e   :  { %1399 = vpow2.f32 %v1337_v58  ;;  %v1338_v10 = vmul.f32 -1.442695, %v562_v59 }
 0x97f   :  { %1401 = vtanh.f32 %v562_v59 }
 0x98b   :  { %v1400_v60 = vpop.eup %1399 }
 0x98c   :  { %v1402_v61 = vpop.eup %1401  ;;  %v570_v62 = vadd.f32 1.0, %v1400_v60 }
 0x98d   :  { %579 = vrot.lane.b32.xlu1 %v1402_v61, %s1500_s8 }
 0x98e   :  { %1403 = vrcp.f32 %v570_v62 }
 0x98f   :  { %1405 = vpow2.f32 %v1338_v10 }
 0x99b   :  { %v1404_v63 = vpop.eup %1403 }
 0x99c   :  { %v589_v1 = vmul.f32 %v1404_v63, %v1402_v61  ;;  %v1406_v2 = vpop.eup %1405  ;;  %v577_v22 = vmul.f32 %v1404_v63, %v1817_v21 }
 0x99d   :  { %v571_v3 = vadd.f32 1.0, %v1406_v2 }
 0x99e   :  { %591 = vrot.lane.b32.xlu1 %v589_v1, %s1497_s2 }
 0x99f   :  { %1407 = vrcp.f32 %v571_v3 }
 0x9ac   :  { %v1408_v6 = vpop.eup %1407 }
 0x9ad   :  { %v588_v9 = vmul.f32 %v1408_v6, %v1806_v7 }
 0x9ff   :  { %v580_v15 = vpop.permute.xlu1 %579 }
 0xa00   :  { %v582_v4 = vmul.f32 %v1404_v63, %v580_v15 }
 0xa02   :  { %584 = vrot.lane.b32.xlu0 %v582_v4, %s1497_s2 }
 0xa10   :  { %v592_v16 = vpop.permute.xlu1 %591 }
 0xa11   :  { %v1809_v18 = vadd.f32 %v592_v16, %v588_v9 }
 0xa13   :  { %600 = vrot.lane.b32.xlu1 %v1809_v18, %s1497_s2  ;;  %v1876_v2 = vsel %vm151_vm6, %v1809_v18, %v1806_v7 }
 0xa74   :  { %v585_v12 = vpop.permute.xlu0 %584 }
 0xa75   :  { %v1820_v17 = vadd.f32 %v585_v12, %v577_v22 }
 0xa77   :  { %596 = vrot.lane.b32.xlu0 %v1820_v17, %s1499_s1 }
 0xa85   :  { %v601_v14 = vpop.permute.xlu1 %600 }
 0xae9   :  { %v597_v19 = vpop.permute.xlu0 %596 }
 0xaea   :  { %v603_v24 = vsel %vm205_vm1, %v597_v19, %v601_v14 }
 0xaeb   :  { %1409 = vtanh.f32 %v603_v24 }
 0xaf8   :  { %v1410_v25 = vpop.eup %1409 }
 0xaf9   :  { %606 = vrot.lane.b32.xlu0 %v1410_v25, %s1500_s8  ;;  %v610_v27 = vmul.f32 %v1410_v25, %v1408_v6  ;;  %v1887_v6 = vsel %vm150_vm5, %v1820_v17, %v1817_v21 }
 0xafb   :  { %616 = vrot.lane.b32.xlu1 %v610_v27, %s1499_s1  ;;  %v1831_v20 = vsel %vm151_vm6, %v610_v27, %v1769_v11  ;;  %v1861_v11 = vadd.f32 %v1728_v49, %v1550_v8 }
 0xb6b   :  { %v607_v23 = vpop.permute.xlu0 %606 }
 0xb6c   :  { %v609_v28 = vmul.f32 %v1404_v63, %v607_v23 }
 0xb6d   :  { %v617_v48 = vpop.permute.xlu1 %616 }
 0xb6e   :  { %v1836_v34 = vsel %vm150_vm5, %v609_v28, %v1774_v47 }
 0xb6f   :  { %620 = vrot.lane.b32.xlu0 %v1836_v34, %s1499_s1 }
 0xbe1   :  { %v621_v53 = vpop.permute.xlu0 %620 }
 0xbe2   :  { %v623_v54 = vsel %vm205_vm1, %v617_v48, %v621_v53  ;;  %v761_v53 = vrot.slane %v1865_v26, 2 }
 0xbe3   :  { %1339 = vmatmul.mubr.msk.f32.vlgmr.msra.gmra.mxu0 %vm213_vm2, %v623_v54 }
 0xbe4   :  { %922 = vmatpush1.msra.mxu0 %v1569_v31  ;;  %969 = vmatprep.mubr.f32.mxu0 %v1496_v0 }
 0xbe5   :  { %923 = vmatprep.subr.mxu0 %v1571_v32 }
 0xbe6   :  { %924 = vmatpush1.msra.mxu0 %v1575_v33 }
 0xbe7   :  { %925 = vmatprep.subr.mxu0 %v1581_v35 }
 0xbe8   :  { %926 = vmatpush1.msra.mxu0 %v1585_v36 }
 0xbe9   :  { %927 = vmatprep.subr.mxu0 %v1589_v37 }
 0xbea   :  { %928 = vmatpush1.msra.mxu0 %v1593_v38 }
 0xbeb   :  { %929 = vmatprep.subr.mxu0 %v1596_v39 }
 0xbec   :  { %930 = vmatpush1.msra.mxu0 %v1600_v40 }
 0xbed   :  { %931 = vmatprep.subr.mxu0 %v1604_v41 }
 0xbee   :  { %932 = vmatpush1.msra.mxu0 %v1608_v42 }
 0xbef   :  { %933 = vmatprep.subr.mxu0 %v1612_v43 }
 0xbf0   :  { %934 = vmatpush1.msra.mxu0 %v1616_v44 }
 0xbf1   :  { %935 = vmatprep.subr.mxu0 %v1620_v45 }
 0xbf2   :  { %936 = vmatpush1.msra.mxu0 %v1631_v46 }
 0xbf3   :  { %1193 = vmatprep.subr.mxu0 %v1567_v30 }
 0xca3   :  { %v693_v47 = vpop.f32.mrf.mxu0 }
 0xca4   :  { %v694_v29 = vadd.f32 %v693_v47, %v1861_v11 }
 0xca5   :  { %v695_v55 = vpop.f32.mrf.mxu0 }
 0xca6   :  { %v1340_v56 = vmul.f32 -1.442695, %v694_v29  ;;  %v696_v57 = vadd.f32 %v695_v55, %v1865_v26 }
 0xca8   :  { %1411 = vpow2.f32 %v1340_v56  ;;  %v1341_v50 = vmul.f32 -1.442695, %v696_v57 }
 0xca9   :  { %1413 = vtanh.f32 %v696_v57 }
 0xcb5   :  { %v1412_v58 = vpop.eup %1411 }
 0xcb6   :  { %v1414_v59 = vpop.eup %1413  ;;  %v704_v30 = vadd.f32 1.0, %v1412_v58 }
 0xcb7   :  { %713 = vrot.lane.b32.xlu1 %v1414_v59, %s1500_s8 }
 0xcb8   :  { %1415 = vrcp.f32 %v704_v30 }
 0xcb9   :  { %1417 = vpow2.f32 %v1341_v50 }
 0xcc5   :  { %v1416_v49 = vpop.eup %1415 }
 0xcc6   :  { %v723_v60 = vmul.f32 %v1416_v49, %v1414_v59  ;;  %v1418_v61 = vpop.eup %1417  ;;  %v711_v9 = vmul.f32 %v1416_v49, %v1887_v6 }
 0xcc7   :  { %v705_v62 = vadd.f32 1.0, %v1418_v61 }
 0xcc8   :  { %725 = vrot.lane.b32.xlu1 %v723_v60, %s1497_s2 }
 0xcc9   :  { %1419 = vrcp.f32 %v705_v62 }
 0xcd6   :  { %v1420_v10 = vpop.eup %1419 }
 0xcd7   :  { %v722_v3 = vmul.f32 %v1420_v10, %v1876_v2 }
 0xd29   :  { %v714_v63 = vpop.permute.xlu1 %713 }
 0xd2a   :  { %v716_v1 = vmul.f32 %v1416_v49, %v714_v63 }
 0xd2c   :  { %718 = vrot.lane.b32.xlu0 %v716_v1, %s1497_s2 }
 0xd3a   :  { %v726_v15 = vpop.permute.xlu1 %725 }
 0xd3b   :  { %v1879_v4 = vadd.f32 %v726_v15, %v722_v3 }
 0xd3d   :  { %734 = vrot.lane.b32.xlu1 %v1879_v4, %s1497_s2  ;;  %v1937_v63 = vsel %vm152_vm7, %v1879_v4, %v1876_v2 }
 0xd9e   :  { %v719_v16 = vpop.permute.xlu0 %718 }
 0xd9f   :  { %v1890_v22 = vadd.f32 %v719_v16, %v711_v9 }
 0xda1   :  { %730 = vrot.lane.b32.xlu0 %v1890_v22, %s1499_s1  ;;  %v1948_v15 = vsel %vm151_vm6, %v1890_v22, %v1887_v6 }
 0xdaf   :  { %v735_v7 = vpop.permute.xlu1 %734 }
 0xe13   :  { %v731_v18 = vpop.permute.xlu0 %730 }
 0xe14   :  { %v737_v12 = vsel %vm205_vm1, %v731_v18, %v735_v7 }
 0xe15   :  { %1421 = vtanh.f32 %v737_v12 }
 0xe22   :  { %v1422_v14 = vpop.eup %1421 }
 0xe23   :  { %740 = vrot.lane.b32.xlu0 %v1422_v14, %s1500_s8  ;;  %v744_v19 = vmul.f32 %v1422_v14, %v1420_v10 }
 0xe25   :  { %750 = vrot.lane.b32.xlu1 %v744_v19, %s1499_s1  ;;  %v1901_v21 = vsel %vm152_vm7, %v744_v19, %v1831_v20  ;;  %v760_v20 = vrot.slane %v1861_v11, 2 }
 0xe95   :  { %v741_v17 = vpop.permute.xlu0 %740 }
 0xe96   :  { %v743_v24 = vmul.f32 %v1416_v49, %v741_v17 }
 0xe97   :  { %v751_v27 = vpop.permute.xlu1 %750 }
 0xe98   :  { %v1906_v25 = vsel %vm151_vm6, %v743_v24, %v1836_v34 }
 0xe99   :  { %754 = vrot.lane.b32.xlu0 %v1906_v25, %s1499_s1 }
 0xf0b   :  { %v755_v23 = vpop.permute.xlu0 %754 }
 0xf0c   :  { %v757_v28 = vsel %vm205_vm1, %v751_v27, %v755_v23 }
 0xf0d   :  { %1342 = vmatmul.mubr.msk.f32.vlgmr.msra.gmra.mxu1 %vm213_vm2, %v757_v28 }
 0xf0e   :  { %1060 = vmatpush1.msra.mxu1 %v1569_v31  ;;  %1107 = vmatprep.mubr.f32.mxu1 %v1496_v0 }
 0xf0f   :  { %1061 = vmatprep.subr.mxu1 %v1571_v32 }
 0xf10   :  { %1062 = vmatpush1.msra.mxu1 %v1575_v33 }
 0xf11   :  { %1063 = vmatprep.subr.mxu1 %v1581_v35 }
 0xf12   :  { %1064 = vmatpush1.msra.mxu1 %v1585_v36 }
 0xf13   :  { %1065 = vmatprep.subr.mxu1 %v1589_v37 }
 0xf14   :  { %1066 = vmatpush1.msra.mxu1 %v1593_v38 }
 0xf15   :  { %1067 = vmatprep.subr.mxu1 %v1596_v39 }
 0xf16   :  { %1068 = vmatpush1.msra.mxu1 %v1600_v40 }
 0xf17   :  { %1069 = vmatprep.subr.mxu1 %v1604_v41 }
 0xf18   :  { %1070 = vmatpush1.msra.mxu1 %v1608_v42 }
 0xf19   :  { %1071 = vmatprep.subr.mxu1 %v1612_v43 }
 0xf1a   :  { %1072 = vmatpush1.msra.mxu1 %v1616_v44 }
 0xf1b   :  { %1073 = vmatprep.subr.mxu1 %v1620_v45 }
 0xf1c   :  { %1074 = vmatpush1.msra.mxu1 %v1631_v46 }
 0xfcd   :  { %v833_v34 = vpop.f32.mrf.mxu1 }
 0xfce   :  { %v834_v48 = vadd.f32 %v833_v34, %v760_v20 }
 0xfcf   :  { %v835_v54 = vpop.f32.mrf.mxu1 }
 0xfd0   :  { %v1343_v47 = vmul.f32 -1.442695, %v834_v48  ;;  %v836_v29 = vadd.f32 %v835_v54, %v761_v53 }
 0xfd2   :  { %1423 = vpow2.f32 %v1343_v47  ;;  %v1344_v30 = vmul.f32 -1.442695, %v836_v29 }
 0xfd3   :  { %1425 = vtanh.f32 %v836_v29 }
 0xfdf   :  { %v1424_v55 = vpop.eup %1423 }
 0xfe0   :  { %v1426_v56 = vpop.eup %1425  ;;  %v844_v57 = vadd.f32 1.0, %v1424_v55 }
 0xfe1   :  { %853 = vrot.lane.b32.xlu1 %v1426_v56, %s1500_s8 }
 0xfe2   :  { %1427 = vrcp.f32 %v844_v57 }
 0xfe3   :  { %1429 = vpow2.f32 %v1344_v30 }
 0xfef   :  { %v1428_v58 = vpop.eup %1427 }
 0xff0   :  { %v863_v59 = vmul.f32 %v1428_v58, %v1426_v56  ;;  %v1430_v49 = vpop.eup %1429  ;;  %v851_v9 = vmul.f32 %v1428_v58, %v1948_v15 }
 0xff1   :  { %v845_v60 = vadd.f32 1.0, %v1430_v49 }
 0xff2   :  { %865 = vrot.lane.b32.xlu1 %v863_v59, %s1497_s2 }
 0xff3   :  { %1431 = vrcp.f32 %v845_v60 }
0x1000   :  { %v1432_v62 = vpop.eup %1431 }
0x1001   :  { %v862_v1 = vmul.f32 %v1432_v62, %v1937_v63 }
0x1053   :  { %v854_v50 = vpop.permute.xlu1 %853 }
0x1054   :  { %v856_v61 = vmul.f32 %v1428_v58, %v854_v50 }
0x1056   :  { %858 = vrot.lane.b32.xlu0 %v856_v61, %s1497_s2 }
0x1064   :  { %v866_v10 = vpop.permute.xlu1 %865 }
0x1065   :  { %v1940_v3 = vadd.f32 %v866_v10, %v862_v1  ;;  %v1036_v1 = vrot.slane %v1861_v11, 6 }
0x1067   :  { %874 = vrot.lane.b32.xlu1 %v1940_v3, %s1497_s2  ;;  %v888_v28 = vsel %vm153_vm8, %v1940_v3, %v1937_v63 }
0x10c8   :  { %v859_v16 = vpop.permute.xlu0 %858 }
0x10c9   :  { %v1951_v7 = vadd.f32 %v859_v16, %v851_v9 }
0x10cb   :  { %870 = vrot.lane.b32.xlu0 %v1951_v7, %s1499_s1  ;;  %v886_v53 = vsel %vm152_vm7, %v1951_v7, %v1948_v15  ;;  %v1037_v15 = vrot.slane %v1865_v26, 6 }
0x10d9   :  { %v875_v2 = vpop.permute.xlu1 %874 }
0x113d   :  { %v871_v4 = vpop.permute.xlu0 %870 }
0x113e   :  { %v877_v18 = vsel %vm205_vm1, %v871_v4, %v875_v2 }
0x113f   :  { %1433 = vtanh.f32 %v877_v18 }
0x114c   :  { %v1434_v12 = vpop.eup %1433 }
0x114d   :  { %880 = vrot.lane.b32.xlu0 %v1434_v12, %s1500_s8  ;;  %v884_v14 = vmul.f32 %v1434_v12, %v1432_v62 }
0x114f   :  { %890 = vrot.lane.b32.xlu1 %v884_v14, %s1499_s1  ;;  %v1962_v6 = vsel %vm153_vm8, %v884_v14, %v1901_v21 }
0x11bf   :  { %v881_v22 = vpop.permute.xlu0 %880 }
0x11c0   :  { %v883_v19 = vmul.f32 %v1428_v58, %v881_v22 }
0x11c1   :  { %v891_v24 = vpop.permute.xlu1 %890 }
0x11c2   :  { %v1967_v17 = vsel %vm152_vm7, %v883_v19, %v1906_v25 }
0x11c3   :  { %894 = vrot.lane.b32.xlu0 %v1967_v17, %s1499_s1 }
0x1235   :  { %v895_v27 = vpop.permute.xlu0 %894 }
0x1236   :  { %v897_v23 = vsel %vm205_vm1, %v891_v24, %v895_v27 }
0x1237   :  { %1345 = vmatmul.mubr.msk.f32.vlgmr.msra.gmra.mxu0 %vm213_vm2, %v897_v23 }
0x1238   :  { %1194 = vmatpush1.msra.mxu0 %v1569_v31  ;;  %1241 = vmatprep.mubr.f32.mxu0 %v1496_v0  ;;  %v898_v0 = vrot.slane %v1861_v11, 4 }
0x1239   :  { %1195 = vmatprep.subr.mxu0 %v1571_v32 }
0x123a   :  { %1196 = vmatpush1.msra.mxu0 %v1575_v33  ;;  %v899_v33 = vrot.slane %v1865_v26, 4 }
0x123b   :  { %1197 = vmatprep.subr.mxu0 %v1581_v35 }
0x123c   :  { %1198 = vmatpush1.msra.mxu0 %v1585_v36 }
0x123d   :  { %1199 = vmatprep.subr.mxu0 %v1589_v37 }
0x123e   :  { %1200 = vmatpush1.msra.mxu0 %v1593_v38 }
0x123f   :  { %1201 = vmatprep.subr.mxu0 %v1596_v39 }
0x1240   :  { %1202 = vmatpush1.msra.mxu0 %v1600_v40 }
0x1241   :  { %1203 = vmatprep.subr.mxu0 %v1604_v41 }
0x1242   :  { %1204 = vmatpush1.msra.mxu0 %v1608_v42 }
0x1243   :  { %1205 = vmatprep.subr.mxu0 %v1612_v43 }
0x1244   :  { %1206 = vmatpush1.msra.mxu0 %v1616_v44 }
0x1245   :  { %1207 = vmatprep.subr.mxu0 %v1620_v45 }
0x1246   :  { %1208 = vmatpush1.msra.mxu0 %v1631_v46 }
0x12f7   :  { %v971_v31 = vpop.f32.mrf.mxu0 }
0x12f8   :  { %v972_v32 = vadd.f32 %v971_v31, %v898_v0 }
0x12f9   :  { %v973_v35 = vpop.f32.mrf.mxu0 }
0x12fa   :  { %v1346_v36 = vmul.f32 -1.442695, %v972_v32  ;;  %v974_v37 = vadd.f32 %v973_v35, %v899_v33 }
0x12fc   :  { %1435 = vpow2.f32 %v1346_v36  ;;  %v1347_v43 = vmul.f32 -1.442695, %v974_v37 }
0x12fd   :  { %1437 = vtanh.f32 %v974_v37 }
0x1309   :  { %v1436_v38 = vpop.eup %1435 }
0x130a   :  { %v1438_v39 = vpop.eup %1437  ;;  %v982_v40 = vadd.f32 1.0, %v1436_v38 }
0x130b   :  { %991 = vrot.lane.b32.xlu1 %v1438_v39, %s1500_s8 }
0x130c   :  { %1439 = vrcp.f32 %v982_v40 }
0x130d   :  { %1441 = vpow2.f32 %v1347_v43 }
0x1319   :  { %v1440_v41 = vpop.eup %1439 }
0x131a   :  { %v1001_v42 = vmul.f32 %v1440_v41, %v1438_v39  ;;  %v1442_v44 = vpop.eup %1441  ;;  %v989_v54 = vmul.f32 %v1440_v41, %v886_v53 }
0x131b   :  { %v983_v45 = vadd.f32 1.0, %v1442_v44 }
0x131c   :  { %1003 = vrot.lane.b32.xlu1 %v1001_v42, %s1497_s2 }
0x131d   :  { %1443 = vrcp.f32 %v983_v45 }
0x132a   :  { %v1444_v25 = vpop.eup %1443 }
0x132b   :  { %v1000_v20 = vmul.f32 %v1444_v25, %v888_v28 }
0x137d   :  { %v992_v46 = vpop.permute.xlu1 %991 }
0x137e   :  { %v994_v21 = vmul.f32 %v1440_v41, %v992_v46 }
0x1380   :  { %996 = vrot.lane.b32.xlu0 %v994_v21, %s1497_s2 }
0x138e   :  { %v1004_v34 = vpop.permute.xlu1 %1003 }
0x138f   :  { %v1006_v48 = vadd.f32 %v1004_v34, %v1000_v20  ;;  %v142_v20 = vadd.f32 %v1734_v52, %v1556_v13 }
0x1391   :  { %1012 = vrot.lane.b32.xlu1 %v1006_v48, %s1497_s2  ;;  %v1026_v24 = vsel %vm154_vm9, %v1006_v48, %v888_v28 }
0x13f2   :  { %v997_v47 = vpop.permute.xlu0 %996 }
0x13f3   :  { %v999_v29 = vadd.f32 %v997_v47, %v989_v54 }
0x13f5   :  { %1008 = vrot.lane.b32.xlu0 %v999_v29, %s1499_s1  ;;  %v1024_v31 = vsel %vm153_vm8, %v999_v29, %v886_v53 }
0x1403   :  { %v1013_v55 = vpop.permute.xlu1 %1012 }
0x1467   :  { %v1009_v56 = vpop.permute.xlu0 %1008 }
0x1468   :  { %v1015_v57 = vsel %vm205_vm1, %v1009_v56, %v1013_v55 }
0x1469   :  { %1445 = vtanh.f32 %v1015_v57 }
0x1476   :  { %v1446_v58 = vpop.eup %1445 }
0x1477   :  { %1018 = vrot.lane.b32.xlu0 %v1446_v58, %s1500_s8  ;;  %v1022_v59 = vmul.f32 %v1446_v58, %v1444_v25  ;;  %v140_v25 = vadd.f32 %v1732_v51, %v1550_v8 }
0x1479   :  { %1028 = vrot.lane.b32.xlu1 %v1022_v59, %s1499_s1  ;;  %v1025_v30 = vsel %vm154_vm9, %v1022_v59, %v1962_v6 }
0x14e9   :  { %v1019_v49 = vpop.permute.xlu0 %1018 }
0x14ea   :  { %v1021_v60 = vmul.f32 %v1440_v41, %v1019_v49 }
0x14eb   :  { %v1029_v61 = vpop.permute.xlu1 %1028 }
0x14ec   :  { %v1023_v50 = vsel %vm153_vm8, %v1021_v60, %v1967_v17 }
0x14ed   :  { %1032 = vrot.lane.b32.xlu0 %v1023_v50, %s1499_s1 }
0x155f   :  { %v1033_v62 = vpop.permute.xlu0 %1032 }
0x1560   :  { %v1035_v63 = vsel %vm205_vm1, %v1029_v61, %v1033_v62 }
0x1561   :  { %1348 = vmatmul.mubr.msk.f32.vlgmr.msra.gmra.mxu1 %vm213_vm2, %v1035_v63 }
0x1621   :  { %v1109_v10 = vpop.f32.mrf.mxu1 }
0x1622   :  { %v1110_v3 = vadd.f32 %v1109_v10, %v1036_v1 }
0x1623   :  { %v1111_v9 = vpop.f32.mrf.mxu1 }
0x1624   :  { %v1349_v16 = vmul.f32 -1.442695, %v1110_v3  ;;  %v1112_v7 = vadd.f32 %v1111_v9, %v1037_v15 }
0x1626   :  { %1447 = vpow2.f32 %v1349_v16  ;;  %v1350_v11 = vmul.f32 -1.442695, %v1112_v7 }
0x1627   :  { %1449 = vtanh.f32 %v1112_v7 }
0x1633   :  { %v1448_v2 = vpop.eup %1447 }
0x1634   :  { %v1450_v4 = vpop.eup %1449  ;;  %v1120_v18 = vadd.f32 1.0, %v1448_v2 }
0x1635   :  { %1129 = vrot.lane.b32.xlu1 %v1450_v4, %s1500_s8 }
0x1636   :  { %1451 = vrcp.f32 %v1120_v18 }
0x1637   :  { %1453 = vpow2.f32 %v1350_v11 }
0x1643   :  { %v1452_v12 = vpop.eup %1451 }
0x1644   :  { %v1139_v14 = vmul.f32 %v1452_v12, %v1450_v4  ;;  %v1454_v6 = vpop.eup %1453  ;;  %v1127_v32 = vmul.f32 %v1452_v12, %v1024_v31 }
0x1645   :  { %v1121_v22 = vadd.f32 1.0, %v1454_v6 }
0x1646   :  { %1141 = vrot.lane.b32.xlu1 %v1139_v14, %s1497_s2 }
0x1647   :  { %1455 = vrcp.f32 %v1121_v22 }
0x1654   :  { %v1456_v17 = vpop.eup %1455 }
0x1655   :  { %v1138_v27 = vmul.f32 %v1456_v17, %v1026_v24 }
0x16a7   :  { %v1130_v26 = vpop.permute.xlu1 %1129 }
0x16a8   :  { %v1132_v19 = vmul.f32 %v1452_v12, %v1130_v26 }
0x16aa   :  { %1134 = vrot.lane.b32.xlu0 %v1132_v19, %s1497_s2 }
0x16b8   :  { %v1142_v23 = vpop.permute.xlu1 %1141 }
0x16b9   :  { %v1144_v0 = vadd.f32 %v1142_v23, %v1138_v27 }
0x16bb   :  { %1150 = vrot.lane.b32.xlu1 %v1144_v0, %s1497_s2 }
0x171c   :  { %v1135_v33 = vpop.permute.xlu0 %1134 }
0x171d   :  { %v1137_v35 = vadd.f32 %v1135_v33, %v1127_v32 }
0x171f   :  { %1146 = vrot.lane.b32.xlu0 %v1137_v35, %s1499_s1  ;;  %v1162_v61 = vsel %vm154_vm9, %v1137_v35, %v1024_v31 }
0x172d   :  { %v1151_v36 = vpop.permute.xlu1 %1150 }
0x1791   :  { %v1147_v37 = vpop.permute.xlu0 %1146 }
0x1792   :  { %v1153_v38 = vsel %vm205_vm1, %v1147_v37, %v1151_v36 }
0x1793   :  { %1457 = vtanh.f32 %v1153_v38 }
0x17a0   :  { %v1458_v39 = vpop.eup %1457 }
0x17a1   :  { %1156 = vrot.lane.b32.xlu0 %v1458_v39, %s1500_s8  ;;  %v1160_v40 = vmul.f32 %v1458_v39, %v1456_v17 }
0x17a3   :  { %1166 = vrot.lane.b32.xlu1 %v1160_v40, %s1499_s1  ;;  %v1163_v41 = vsel %vm155_vm10, %v1160_v40, %v1025_v30  ;;  %v1164_v30 = vsel %vm155_vm10, %v1144_v0, %v1026_v24 }
0x1813   :  { %v1157_v42 = vpop.permute.xlu0 %1156 }
0x1814   :  { %v1159_v43 = vmul.f32 %v1452_v12, %v1157_v42 }
0x1815   :  { %v1167_v45 = vpop.permute.xlu1 %1166 }
0x1816   :  { %v1161_v44 = vsel %vm154_vm9, %v1159_v43, %v1023_v50 }
0x1817   :  { %1170 = vrot.lane.b32.xlu0 %v1161_v44, %s1499_s1 }
0x1889   :  { %v1171_v46 = vpop.permute.xlu0 %1170 }
0x188a   :  { %v1173_v21 = vsel %vm205_vm1, %v1167_v45, %v1171_v46 }
0x188b   :  { %1351 = vmatmul.mubr.msk.f32.vlgmr.msra.gmra.mxu0 %vm213_vm2, %v1173_v21 }
0x194b   :  { %v1243_v28 = vpop.f32.mrf.mxu0 }
0x194c   :  { %v1244_v34 = vadd.f32 %v1243_v28, %v140_v25 }
0x194d   :  { %v1245_v48 = vpop.f32.mrf.mxu0 }
0x194e   :  { %v1352_v53 = vmul.f32 -1.442695, %v1244_v34  ;;  %v1246_v54 = vadd.f32 %v1245_v48, %v142_v20 }
0x1950   :  { %1459 = vpow2.f32 %v1352_v53  ;;  %v1353_v8 = vmul.f32 -1.442695, %v1246_v54 }
0x1951   :  { %1461 = vtanh.f32 %v1246_v54 }
0x195d   :  { %v1460_v47 = vpop.eup %1459 }
0x195e   :  { %v1462_v29 = vpop.eup %1461  ;;  %v1254_v55 = vadd.f32 1.0, %v1460_v47 }
0x195f   :  { %1263 = vrot.lane.b32.xlu1 %v1462_v29, %s1500_s8 }
0x1960   :  { %1463 = vrcp.f32 %v1254_v55 }
0x1961   :  { %1465 = vpow2.f32 %v1353_v8 }
0x196d   :  { %v1464_v56 = vpop.eup %1463 }
0x196e   :  { %v1273_v57 = vmul.f32 %v1464_v56, %v1462_v29  ;;  %v1466_v51 = vpop.eup %1465  ;;  %v1261_v62 = vmul.f32 %v1464_v56, %v1162_v61 }
0x196f   :  { %v1255_v13 = vadd.f32 1.0, %v1466_v51 }
0x1970   :  { %1275 = vrot.lane.b32.xlu1 %v1273_v57, %s1497_s2 }
0x1971   :  { %1467 = vrcp.f32 %v1255_v13 }
0x197e   :  { %v1468_v59 = vpop.eup %1467 }
0x197f   :  { %v1272_v49 = vmul.f32 %v1468_v59, %v1164_v30 }
0x19d1   :  { %v1264_v52 = vpop.permute.xlu1 %1263 }
0x19d2   :  { %v1266_v58 = vmul.f32 %v1464_v56, %v1264_v52 }
0x19d4   :  { %1268 = vrot.lane.b32.xlu0 %v1266_v58, %s1497_s2 }
0x19e2   :  { %v1276_v60 = vpop.permute.xlu1 %1275 }
0x19e3   :  { %v1278_v50 = vadd.f32 %v1276_v60, %v1272_v49 }
0x19e5   :  { %1284 = vrot.lane.b32.xlu1 %v1278_v50, %s1497_s2  ;;  %v1298_v2 = vsel %vm156_vm11, %v1278_v50, %v1164_v30 }
0x1a46   :  { %v1269_v63 = vpop.permute.xlu0 %1268 }
0x1a47   :  { %v1271_v1 = vadd.f32 %v1269_v63, %v1261_v62 }
0x1a49   :  { %1280 = vrot.lane.b32.xlu0 %v1271_v1, %s1499_s1  ;;  %v1296_v14 = vsel %vm155_vm10, %v1271_v1, %v1162_v61 }
0x1a57   :  { %v1285_v10 = vpop.permute.xlu1 %1284 }
0x1abb   :  { %v1281_v3 = vpop.permute.xlu0 %1280 }
0x1abc   :  { %v1287_v15 = vsel %vm205_vm1, %v1281_v3, %v1285_v10 }
0x1abd   :  { %1469 = vtanh.f32 %v1287_v15 }
0x1aca   :  { %v1470_v9 = vpop.eup %1469 }
0x1acb   :  { %1290 = vrot.lane.b32.xlu0 %v1470_v9, %s1500_s8  ;;  %v1294_v16 = vmul.f32 %v1470_v9, %v1468_v59 }
0x1acd   :  { %v1297_v7 = vsel %vm156_vm11, %v1294_v16, %v1163_v41 }
0x1ace   :  { %1300 = vrot.lane.b32.xlu1 %v1297_v7, %s1499_s1 }
0x1ad2   :  { %1308 = vrot.lane.b32.xlu1 %v1298_v2, %s1500_s8 }
0x1b3d   :  { %v1291_v4 = vpop.permute.xlu0 %1290 }
0x1b3e   :  { %v1293_v18 = vmul.f32 %v1464_v56, %v1291_v4 }
0x1b40   :  { %v1295_v12 = vsel %vm155_vm10, %v1293_v18, %v1161_v44  ;;  %v1301_v11 = vpop.permute.xlu1 %1300 }
0x1b41   :  { %1304 = vrot.lane.b32.xlu0 %v1295_v12, %s1499_s1 }
0x1b44   :  { %v1309_v26 = vpop.permute.xlu1 %1308 }
0x1b45   :  { %1312 = vrot.lane.b32.xlu0 %v1296_v14, %s1500_s8 }
0x1bb3   :  { %v1305_v6 = vpop.permute.xlu0 %1304 }
0x1bb4   :  { %v1315_v22 = vsel %vm205_vm1, %v1301_v11, %v1305_v6 }
0x1bb5   :  { %v1316_v17 = vsel %vm213_vm2, %v1315_v22, %v1309_v26 }
0x1bb7   :  { %v1313_v19 = vpop.permute.xlu0 %1312 }
0x1bb8   :  { %v1318_v24 = vsel %vm1317_vm12, %v1316_v17, %v1313_v19 }
0x1bb9   :  { %1319 = vst [vmem:[%s2073_s5] sm:$0x3] %v1318_v24 }
0x1bba   :  { %1324 = vsyncpa [#allocation3], 1 }

</bundles_post_ra>
